<compile_context>
chip_gen: v5e
topology: v5e:2x2
jax: 0.10.0
libtpu: 0.0.40
codegen_flags: <defaults>
</compile_context>

<pallas_src>
import functools
import math

import jax
import jax.numpy as jnp
import numpy as np
from jax import lax
from jax.experimental import pallas as pl
from jax.experimental.pallas import tpu as pltpu

LN_EPS = 1e-6
_NEG_INF = -1e18

_PARAM_ORDER = ("ln1_g", "ln1_b", "wq", "bq", "wk", "bk", "wv", "bv",
                "wo", "bo", "ln2_g", "ln2_b", "w1", "b1", "w2", "b2")
_MATMUL_PARAMS = frozenset({"wq", "wk", "wv", "wo", "w1", "w2"})


def _layernorm(x, g, b):
    # Two-pass LN (mean, then variance of the centered values): matches the
    # reference numerics; avoids E[x^2]-E[x]^2 catastrophic cancellation.
    mu = jnp.mean(x, axis=-1, keepdims=True)
    xc = x - mu
    var = jnp.mean(xc * xc, axis=-1, keepdims=True)
    return xc * lax.rsqrt(var + LN_EPS) * g + b


def _encoder_layer_kernel(heads, tq, tk, cdt,
                          x_ref, mask_ref,
                          ln1_g, ln1_b,
                          wq, bq, wk, bk, wv, bv, wo, bo,
                          ln2_g, ln2_b,
                          w1, b1, w2, b2,
                          o_ref,
                          k_scr, v_scr):
    S, D = x_ref.shape[1], x_ref.shape[2]
    H = heads
    dh = D // H
    nk = S // tk
    f32 = jnp.float32
    exact = jnp.dtype(cdt) == jnp.dtype(jnp.float32)

    qi = pl.program_id(1)

    # ---------------- hoisted per-batch-row work (q block 0 only) ----------
    # LN over all S rows + K/V projections, stored head-major in VMEM scratch
    # so every key-tile slice is already a batch-leading 3-D MXU operand
    # (no per-query-block (S, D) transposes).
    @pl.when(qi == 0)
    def _compute_kv():
        xn_all = _layernorm(x_ref[0], ln1_g[...], ln1_b[...]).astype(cdt)  # (S,D)
        k = jnp.dot(xn_all, wk[...], preferred_element_type=f32) + bk[...]
        v = jnp.dot(xn_all, wv[...], preferred_element_type=f32) + bv[...]
        k_scr[...] = jnp.transpose(k.reshape(S, H, dh), (1, 0, 2)).astype(cdt)
        v_scr[...] = jnp.transpose(v.reshape(S, H, dh), (1, 0, 2)).astype(cdt)

    # ---------------- per-query-block work ---------------------------------
    row0 = pl.multiple_of(qi * tq, tq)
    x_q = x_ref[0, pl.ds(row0, tq), :]                      # (TQ, D) f32
    xn_q = _layernorm(x_q, ln1_g[...], ln1_b[...])

    # 1/sqrt(dh) is folded into wq / bq at the call boundary.
    q = jnp.dot(xn_q.astype(cdt), wq[...], preferred_element_type=f32) + bq[...]
    qh = jnp.transpose(q.reshape(tq, H, dh), (1, 0, 2)).astype(cdt)   # (H,TQ,dh)

    # Flash-style online softmax over key tiles: working set is (H, TQ, TK),
    # never (H, TQ, S), so VMEM / vreg pressure is bounded for long sequences.
    def kv_step(kt, carry):
        m_prev, l_prev, acc_prev = carry
        k0 = pl.multiple_of(kt * tk, tk)
        kh = k_scr[:, pl.ds(k0, tk), :]                     # (H,TK,dh) cdt
        vh = v_scr[:, pl.ds(k0, tk), :]                     # (H,TK,dh) cdt
        s = jnp.einsum("hqd,hkd->hqk", qh, kh,
                       preferred_element_type=f32)          # (H,TQ,TK) f32
        s = s + mask_ref[0, kt]                             # (1,TK) additive mask
        m_new = jnp.maximum(m_prev, jnp.max(s, axis=-1, keepdims=True))
        alpha = jnp.exp(m_prev - m_new)                     # (H,TQ,1) f32
        # exp in the compute dtype (bf16 on v6e/v7x); running sum stays f32.
        p = jnp.exp((s - m_new).astype(cdt))
        l_new = alpha * l_prev + jnp.sum(p.astype(f32), axis=-1, keepdims=True)
        ctx = jnp.einsum("hqk,hkd->hqd", p, vh, preferred_element_type=f32)
        acc_new = alpha * acc_prev + ctx
        return m_new, l_new, acc_new

    m0 = jnp.full((H, tq, 1), -1e30, f32)
    l0 = jnp.zeros((H, tq, 1), f32)
    a0 = jnp.zeros((H, tq, dh), f32)
    _, l_f, acc = lax.fori_loop(0, nk, kv_step, (m0, l0, a0))

    # NOTE: fully-masked rows get uniform attention (not NaN as in PyTorch).
    inv_l = pl.reciprocal(l_f, approx=not exact)            # exact on f32 path
    ctx = jnp.transpose(acc * inv_l, (1, 0, 2)).reshape(tq, D)

    attn_out = jnp.dot(ctx.astype(cdt), wo[...],
                       preferred_element_type=f32) + bo[...]
    # TODO(synk): dropout is identity (eval mode); training dropout not implemented.
    out = attn_out + x_q

    # ---------------- position-wise feed-forward (pre-LN) ------------------
    # TODO(synk): for very large d_ff, K-tile w1/w2 (loop over F blocks with an
    # f32 accumulator) and single-buffer the resident weight BlockSpecs instead
    # of holding both (D,F) matrices double-buffered in VMEM.
    on = _layernorm(out, ln2_g[...], ln2_b[...])
    inter = jnp.maximum(
        jnp.dot(on.astype(cdt), w1[...], preferred_element_type=f32) + b1[...],
        0.0)
    ff = jnp.dot(inter.astype(cdt), w2[...], preferred_element_type=f32) + b2[...]
    o_ref[0] = (ff + out).astype(o_ref.dtype)


def _default_vmem_limit():
    # Leave >=16 MiB headroom below physical VMEM: ~112 MiB on v5e/v6e
    # (128 MiB physical), ~48 MiB when only 64 MiB (v7x) or unknown.
    cap = 64 * 1024 * 1024
    try:
        cap = int(pltpu.get_tpu_info().vmem_capacity_bytes)
    except Exception:
        pass
    return int(max(32 * 1024 * 1024,
                   min(cap - 16 * 1024 * 1024, 112 * 1024 * 1024)))


def transformer_encoder_layer(x, key_pad_mask, params, heads, *,
                              q_block=256, k_block=512,
                              compute_dtype=jnp.bfloat16,
                              vmem_limit_bytes=None):
    """x: (B,S,D) f32. key_pad_mask: (B,S), 1.0 == padded key position."""
    B, S, D = x.shape
    tq = min(q_block, S)
    tk = min(k_block, S)
    assert S % tq == 0, "S must be a multiple of the query block size"
    assert tq == S or tq % 8 == 0, "query block must be a multiple of 8"
    assert S % tk == 0, "S must be a multiple of the key block size"
    assert tk == S or tk % 8 == 0, "key block must be a multiple of 8"
    assert D % heads == 0
    nk = S // tk
    dh = D // heads
    scale = 1.0 / math.sqrt(dh)

    # Additive key-pad mask, pre-tiled per key block: (B, nk, 1, tk) with 0
    # where valid and -1e18 where padded.  The key-tile index is a major dim,
    # so the kernel never dynamically slices the lane dimension.
    pad = jnp.asarray(key_pad_mask, jnp.float32) > 0.0
    addmask = jnp.where(pad, _NEG_INF, 0.0).astype(jnp.float32)
    addmask = addmask.reshape(B, nk, tk)[:, :, None, :]

    def _prep(name):
        a = params[name]
        if name in ("wq", "bq"):            # fold 1/sqrt(dh) into the Q projection
            a = a * scale
        return a.astype(compute_dtype) if name in _MATMUL_PARAMS \
            else a.astype(jnp.float32)

    plist = [_prep(n) for n in _PARAM_ORDER]

    def _const_map(ndim):
        return lambda *_: (0,) * ndim

    in_specs = [
        pl.BlockSpec((1, S, D), lambda b, q: (b, 0, 0)),          # full seq (K/V src)
        pl.BlockSpec((1, nk, 1, tk), lambda b, q: (b, 0, 0, 0)),  # mask tiles
    ] + [pl.BlockSpec(a.shape, _const_map(a.ndim)) for a in plist]

    if vmem_limit_bytes is None:
        vmem_limit_bytes = _default_vmem_limit()

    kernel = functools.partial(_encoder_layer_kernel, heads, tq, tk, compute_dtype)

    return pl.pallas_call(
        kernel,
        out_shape=jax.ShapeDtypeStruct((B, S, D), jnp.float32),
        grid=(B, S // tq),
        in_specs=in_specs,
        out_specs=pl.BlockSpec((1, tq, D), lambda b, q: (b, q, 0)),  # lane-dense on D
        scratch_shapes=[pltpu.VMEM((heads, S, dh), compute_dtype),   # K (head-major)
                        pltpu.VMEM((heads, S, dh), compute_dtype)],  # V (head-major)
        compiler_params=pltpu.CompilerParams(
            # b is megacore-shardable; q must stay in-order so the K/V scratch
            # computed at q == 0 is reused by later query blocks of the row.
            dimension_semantics=("parallel", "arbitrary"),
            vmem_limit_bytes=int(vmem_limit_bytes)),
    )(x.astype(jnp.float32), addmask, *plist)


def reference(x, key_pad_mask, params, heads):
    """Pure-JAX reference mirroring the PyTorch forward (eval mode)."""
    B, S, D = x.shape
    dh = D // heads
    scale = 1.0 / math.sqrt(dh)

    def ln(v, g, b):
        mu = jnp.mean(v, axis=-1, keepdims=True)
        var = jnp.mean((v - mu) ** 2, axis=-1, keepdims=True)
        return (v - mu) * jax.lax.rsqrt(var + LN_EPS) * g + b

    xn = ln(x, params["ln1_g"], params["ln1_b"])
    q = xn @ params["wq"] + params["bq"]
    k = xn @ params["wk"] + params["bk"]
    v = xn @ params["wv"] + params["bv"]

    def split(t):
        return t.reshape(B, S, heads, dh).transpose(0, 2, 1, 3)  # (B,H,S,dh)

    qh, kh, vh = split(q) * scale, split(k), split(v)
    s = jnp.einsum("bhqd,bhkd->bhqk", qh, kh)
    s = s + jnp.where(jnp.asarray(key_pad_mask) > 0, _NEG_INF, 0.0)[:, None, None, :]
    p = jax.nn.softmax(s, axis=-1)
    ctx = jnp.einsum("bhqk,bhkd->bhqd", p, vh).transpose(0, 2, 1, 3).reshape(B, S, D)
    attn_out = ctx @ params["wo"] + params["bo"]
    out = attn_out + x

    on = ln(out, params["ln2_g"], params["ln2_b"])
    inter = jnp.maximum(on @ params["w1"] + params["b1"], 0.0)
    return inter @ params["w2"] + params["b2"] + out


def init_params(key, d_model, d_ff):
    ks = jax.random.split(key, 12)

    def lin(k, din, dout):
        return jax.random.normal(k, (din, dout), jnp.float32) / math.sqrt(din)

    def bias(k, dout):
        return 0.02 * jax.random.normal(k, (1, dout), jnp.float32)

    return {
        "ln1_g": 1.0 + 0.1 * jax.random.normal(ks[0], (1, d_model), jnp.float32),
        "ln1_b": 0.05 * jax.random.normal(ks[1], (1, d_model), jnp.float32),
        "wq": lin(ks[2], d_model, d_model), "bq": bias(ks[3], d_model),
        "wk": lin(ks[4], d_model, d_model), "bk": bias(ks[5], d_model),
        "wv": lin(ks[6], d_model, d_model), "bv": bias(ks[7], d_model),
        "wo": lin(ks[8], d_model, d_model), "bo": bias(ks[9], d_model),
        "ln2_g": 1.0 + 0.1 * jax.random.normal(ks[10], (1, d_model), jnp.float32),
        "ln2_b": 0.05 * jax.random.normal(ks[11], (1, d_model), jnp.float32),
        "w1": lin(jax.random.fold_in(key, 101), d_model, d_ff),
        "b1": bias(jax.random.fold_in(key, 102), d_ff),
        "w2": lin(jax.random.fold_in(key, 103), d_ff, d_model),
        "b2": bias(jax.random.fold_in(key, 104), d_model),
    }


if __name__ == "__main__":
    # Small toy shapes (for efficiency on real workloads keep D a multiple of
    # 128 and head dim dh in {64, 128}; here shapes are deliberately tiny).
    B, S, D, H, F = 2, 16, 64, 4, 128
    key = jax.random.PRNGKey(0)
    kx, kp = jax.random.split(key, 2)

    x = jax.random.normal(kx, (B, S, D), jnp.float32)
    # key-padding: batch 0 has no padding, batch 1 pads the last 3 positions
    lengths = jnp.array([S, S - 3])
    key_pad = (jnp.arange(S)[None, :] >= lengths[:, None]).astype(jnp.float32)  # (B,S)

    params = init_params(kp, D, F)
    ref = reference(x, key_pad, params, H)

    # f32 path: strict semantics check (exact reciprocal, two-pass LN);
    # small blocks so the query tiling AND the flash key loop are exercised.
    out_f32 = transformer_encoder_layer(x, key_pad, params, H,
                                        q_block=8, k_block=8,
                                        compute_dtype=jnp.float32)
    jax.block_until_ready(out_f32)
    np.testing.assert_allclose(np.asarray(out_f32), np.asarray(ref),
                               rtol=5e-3, atol=5e-3)

    # bf16-MXU path (f32 accumulation, bf16 exp): relaxed tolerance.
    out_bf16 = transformer_encoder_layer(x, key_pad, params, H,
                                         q_block=8, k_block=8,
                                         compute_dtype=jnp.bfloat16)
    jax.block_until_ready(out_bf16)
    np.testing.assert_allclose(np.asarray(out_bf16), np.asarray(ref),
                               rtol=1e-1, atol=1e-1)

    print("KERNEL_OK")
</pallas_src>

<mosaic_0001>
module attributes {stable_mosaic.version = 11 : i64} {
  func.func @_encoder_layer_kernel(%arg0: i32, %arg1: i32, %arg2: memref<1x16x64xf32, #tpu.memory_space<vmem>>, %arg3: memref<1x2x1x8xf32, #tpu.memory_space<vmem>>, %arg4: memref<1x64xf32, #tpu.memory_space<vmem>>, %arg5: memref<1x64xf32, #tpu.memory_space<vmem>>, %arg6: memref<64x64xf32, #tpu.memory_space<vmem>>, %arg7: memref<1x64xf32, #tpu.memory_space<vmem>>, %arg8: memref<64x64xf32, #tpu.memory_space<vmem>>, %arg9: memref<1x64xf32, #tpu.memory_space<vmem>>, %arg10: memref<64x64xf32, #tpu.memory_space<vmem>>, %arg11: memref<1x64xf32, #tpu.memory_space<vmem>>, %arg12: memref<64x64xf32, #tpu.memory_space<vmem>>, %arg13: memref<1x64xf32, #tpu.memory_space<vmem>>, %arg14: memref<1x64xf32, #tpu.memory_space<vmem>>, %arg15: memref<1x64xf32, #tpu.memory_space<vmem>>, %arg16: memref<64x128xf32, #tpu.memory_space<vmem>>, %arg17: memref<1x128xf32, #tpu.memory_space<vmem>>, %arg18: memref<128x64xf32, #tpu.memory_space<vmem>>, %arg19: memref<1x64xf32, #tpu.memory_space<vmem>>, %arg20: memref<1x8x64xf32, #tpu.memory_space<vmem>>, %arg21: memref<4x16x16xf32, #tpu.memory_space<vmem>>, %arg22: memref<4x16x16xf32, #tpu.memory_space<vmem>>) attributes {dimension_semantics = [#tpu.dimension_semantics<parallel>, #tpu.dimension_semantics<arbitrary>], iteration_bounds = array<i64: 2, 2>, scalar_prefetch = 0 : i64, scratch_operands = 2 : i64, tpu.core_type = #tpu.core_type<tc>, window_params = [{transform_indices = @transform_0, window_bounds = array<i64: 1, 16, 64>}, {transform_indices = @transform_1, window_bounds = array<i64: 1, 2, 1, 8>}, {pipeline_mode = #tpu.pipeline_mode<synchronous>, transform_indices = @transform_2, window_bounds = array<i64: 1, 64>}, {pipeline_mode = #tpu.pipeline_mode<synchronous>, transform_indices = @transform_3, window_bounds = array<i64: 1, 64>}, {pipeline_mode = #tpu.pipeline_mode<synchronous>, transform_indices = @transform_4, window_bounds = array<i64: 64, 64>}, {pipeline_mode = #tpu.pipeline_mode<synchronous>, transform_indices = @transform_5, window_bounds = array<i64: 1, 64>}, {pipeline_mode = #tpu.pipeline_mode<synchronous>, transform_indices = @transform_6, window_bounds = array<i64: 64, 64>}, {pipeline_mode = #tpu.pipeline_mode<synchronous>, transform_indices = @transform_7, window_bounds = array<i64: 1, 64>}, {pipeline_mode = #tpu.pipeline_mode<synchronous>, transform_indices = @transform_8, window_bounds = array<i64: 64, 64>}, {pipeline_mode = #tpu.pipeline_mode<synchronous>, transform_indices = @transform_9, window_bounds = array<i64: 1, 64>}, {pipeline_mode = #tpu.pipeline_mode<synchronous>, transform_indices = @transform_10, window_bounds = array<i64: 64, 64>}, {pipeline_mode = #tpu.pipeline_mode<synchronous>, transform_indices = @transform_11, window_bounds = array<i64: 1, 64>}, {pipeline_mode = #tpu.pipeline_mode<synchronous>, transform_indices = @transform_12, window_bounds = array<i64: 1, 64>}, {pipeline_mode = #tpu.pipeline_mode<synchronous>, transform_indices = @transform_13, window_bounds = array<i64: 1, 64>}, {pipeline_mode = #tpu.pipeline_mode<synchronous>, transform_indices = @transform_14, window_bounds = array<i64: 64, 128>}, {pipeline_mode = #tpu.pipeline_mode<synchronous>, transform_indices = @transform_15, window_bounds = array<i64: 1, 128>}, {pipeline_mode = #tpu.pipeline_mode<synchronous>, transform_indices = @transform_16, window_bounds = array<i64: 128, 64>}, {pipeline_mode = #tpu.pipeline_mode<synchronous>, transform_indices = @transform_17, window_bounds = array<i64: 1, 64>}, {transform_indices = @transform_18, window_bounds = array<i64: 1, 8, 64>}]} {
    %c0_i32 = arith.constant 0 : i32
    %0 = arith.cmpi eq, %arg1, %c0_i32 : i32
    %1 = arith.extui %0 : i1 to i32
    %c0_i32_0 = arith.constant 0 : i32
    %2 = arith.cmpi ne, %1, %c0_i32_0 : i32
    scf.if %2 {
      %c0_48 = arith.constant 0 : index
      %c0_49 = arith.constant 0 : index
      %c0_50 = arith.constant 0 : index
      %91 = vector.load %arg2[%c0_48, %c0_49, %c0_50] : memref<1x16x64xf32, #tpu.memory_space<vmem>>, vector<1x16x64xf32>
      %92 = vector.shape_cast %91 : vector<1x16x64xf32> to vector<16x64xf32>
      %c0_51 = arith.constant 0 : index
      %c0_52 = arith.constant 0 : index
      %93 = vector.load %arg4[%c0_51, %c0_52] : memref<1x64xf32, #tpu.memory_space<vmem>>, vector<1x64xf32>
      %c0_53 = arith.constant 0 : index
      %c0_54 = arith.constant 0 : index
      %94 = vector.load %arg5[%c0_53, %c0_54] : memref<1x64xf32, #tpu.memory_space<vmem>>, vector<1x64xf32>
      %cst_55 = arith.constant dense<0.000000e+00> : vector<16xf32>
      %95 = vector.multi_reduction <add>, %92, %cst_55 [1] : vector<16x64xf32> to vector<16xf32>
      %96 = vector.shape_cast %95 : vector<16xf32> to vector<16x1xf32>
      %cst_56 = arith.constant 6.400000e+01 : f32
      %97 = vector.broadcast %cst_56 : f32 to vector<16x1xf32>
      %98 = arith.divf %96, %97 : vector<16x1xf32>
      %99 = vector.broadcast %98 : vector<16x1xf32> to vector<16x64xf32>
      %100 = arith.subf %92, %99 : vector<16x64xf32>
      %101 = arith.mulf %100, %100 : vector<16x64xf32>
      %cst_57 = arith.constant dense<0.000000e+00> : vector<16xf32>
      %102 = vector.multi_reduction <add>, %101, %cst_57 [1] : vector<16x64xf32> to vector<16xf32>
      %103 = vector.shape_cast %102 : vector<16xf32> to vector<16x1xf32>
      %cst_58 = arith.constant 6.400000e+01 : f32
      %104 = vector.broadcast %cst_58 : f32 to vector<16x1xf32>
      %105 = arith.divf %103, %104 : vector<16x1xf32>
      %cst_59 = arith.constant 9.99999997E-7 : f32
      %106 = vector.broadcast %cst_59 : f32 to vector<16x1xf32>
      %107 = arith.addf %105, %106 : vector<16x1xf32>
      %108 = math.rsqrt %107 : vector<16x1xf32>
      %109 = vector.broadcast %108 : vector<16x1xf32> to vector<16x64xf32>
      %110 = arith.mulf %100, %109 : vector<16x64xf32>
      %111 = vector.broadcast %93 : vector<1x64xf32> to vector<16x64xf32>
      %112 = arith.mulf %110, %111 : vector<16x64xf32>
      %113 = vector.broadcast %94 : vector<1x64xf32> to vector<16x64xf32>
      %114 = arith.addf %112, %113 : vector<16x64xf32>
      %c0_60 = arith.constant 0 : index
      %c0_61 = arith.constant 0 : index
      %115 = vector.load %arg8[%c0_60, %c0_61] : memref<64x64xf32, #tpu.memory_space<vmem>>, vector<64x64xf32>
      %cst_62 = arith.constant dense<0.000000e+00> : vector<16x64xf32>
      %116 = tpu.matmul %114, %115, %cst_62 {dimension_numbers = #tpu.dot_dimension_numbers<[1], [0], [0], [1], [0, 0, 1, 1], [], []>} : vector<16x64xf32>, vector<64x64xf32>, vector<16x64xf32> -> vector<16x64xf32>
      %c0_63 = arith.constant 0 : index
      %c0_64 = arith.constant 0 : index
      %117 = vector.load %arg9[%c0_63, %c0_64] : memref<1x64xf32, #tpu.memory_space<vmem>>, vector<1x64xf32>
      %118 = vector.broadcast %117 : vector<1x64xf32> to vector<16x64xf32>
      %119 = arith.addf %116, %118 : vector<16x64xf32>
      %c0_65 = arith.constant 0 : index
      %c0_66 = arith.constant 0 : index
      %120 = vector.load %arg10[%c0_65, %c0_66] : memref<64x64xf32, #tpu.memory_space<vmem>>, vector<64x64xf32>
      %cst_67 = arith.constant dense<0.000000e+00> : vector<16x64xf32>
      %121 = tpu.matmul %114, %120, %cst_67 {dimension_numbers = #tpu.dot_dimension_numbers<[1], [0], [0], [1], [0, 0, 1, 1], [], []>} : vector<16x64xf32>, vector<64x64xf32>, vector<16x64xf32> -> vector<16x64xf32>
      %c0_68 = arith.constant 0 : index
      %c0_69 = arith.constant 0 : index
      %122 = vector.load %arg11[%c0_68, %c0_69] : memref<1x64xf32, #tpu.memory_space<vmem>>, vector<1x64xf32>
      %123 = vector.broadcast %122 : vector<1x64xf32> to vector<16x64xf32>
      %124 = arith.addf %121, %123 : vector<16x64xf32>
      %125 = vector.shape_cast %119 : vector<16x64xf32> to vector<16x4x16xf32>
      %126 = tpu.transpose %125, [1, 0, 2] : vector<16x4x16xf32> -> vector<4x16x16xf32>
      %c0_70 = arith.constant 0 : index
      %c0_71 = arith.constant 0 : index
      %c0_72 = arith.constant 0 : index
      %127 = vector.load %arg21[%c0_70, %c0_71, %c0_72] : memref<4x16x16xf32, #tpu.memory_space<vmem>>, vector<4x16x16xf32>
      tpu.vector_store %arg21[%c0_70, %c0_71, %c0_72], %126 {strides = array<i32>} : memref<4x16x16xf32, #tpu.memory_space<vmem>>, vector<4x16x16xf32>,
      %128 = vector.shape_cast %124 : vector<16x64xf32> to vector<16x4x16xf32>
      %129 = tpu.transpose %128, [1, 0, 2] : vector<16x4x16xf32> -> vector<4x16x16xf32>
      %c0_73 = arith.constant 0 : index
      %c0_74 = arith.constant 0 : index
      %c0_75 = arith.constant 0 : index
      %130 = vector.load %arg22[%c0_73, %c0_74, %c0_75] : memref<4x16x16xf32, #tpu.memory_space<vmem>>, vector<4x16x16xf32>
      tpu.vector_store %arg22[%c0_73, %c0_74, %c0_75], %129 {strides = array<i32>} : memref<4x16x16xf32, #tpu.memory_space<vmem>>, vector<4x16x16xf32>,
    } else {
    }
    %c8_i32 = arith.constant 8 : i32
    %3 = arith.muli %arg1, %c8_i32 : i32
    %4 = tpu.assume_multiple %3, 8 : i32
    %c0 = arith.constant 0 : index
    %5 = arith.index_cast %4 : i32 to index
    %c0_1 = arith.constant 0 : index
    %6 = vector.load %arg2[%c0, %5, %c0_1] : memref<1x16x64xf32, #tpu.memory_space<vmem>>, vector<1x8x64xf32>
    %7 = vector.shape_cast %6 : vector<1x8x64xf32> to vector<8x64xf32>
    %c0_2 = arith.constant 0 : index
    %c0_3 = arith.constant 0 : index
    %8 = vector.load %arg4[%c0_2, %c0_3] : memref<1x64xf32, #tpu.memory_space<vmem>>, vector<1x64xf32>
    %c0_4 = arith.constant 0 : index
    %c0_5 = arith.constant 0 : index
    %9 = vector.load %arg5[%c0_4, %c0_5] : memref<1x64xf32, #tpu.memory_space<vmem>>, vector<1x64xf32>
    %cst = arith.constant dense<0.000000e+00> : vector<8xf32>
    %10 = vector.multi_reduction <add>, %7, %cst [1] : vector<8x64xf32> to vector<8xf32>
    %11 = vector.shape_cast %10 : vector<8xf32> to vector<8x1xf32>
    %cst_6 = arith.constant 6.400000e+01 : f32
    %12 = vector.broadcast %cst_6 : f32 to vector<8x1xf32>
    %13 = arith.divf %11, %12 : vector<8x1xf32>
    %14 = vector.broadcast %13 : vector<8x1xf32> to vector<8x64xf32>
    %15 = arith.subf %7, %14 : vector<8x64xf32>
    %16 = arith.mulf %15, %15 : vector<8x64xf32>
    %cst_7 = arith.constant dense<0.000000e+00> : vector<8xf32>
    %17 = vector.multi_reduction <add>, %16, %cst_7 [1] : vector<8x64xf32> to vector<8xf32>
    %18 = vector.shape_cast %17 : vector<8xf32> to vector<8x1xf32>
    %cst_8 = arith.constant 6.400000e+01 : f32
    %19 = vector.broadcast %cst_8 : f32 to vector<8x1xf32>
    %20 = arith.divf %18, %19 : vector<8x1xf32>
    %cst_9 = arith.constant 9.99999997E-7 : f32
    %21 = vector.broadcast %cst_9 : f32 to vector<8x1xf32>
    %22 = arith.addf %20, %21 : vector<8x1xf32>
    %23 = math.rsqrt %22 : vector<8x1xf32>
    %24 = vector.broadcast %23 : vector<8x1xf32> to vector<8x64xf32>
    %25 = arith.mulf %15, %24 : vector<8x64xf32>
    %26 = vector.broadcast %8 : vector<1x64xf32> to vector<8x64xf32>
    %27 = arith.mulf %25, %26 : vector<8x64xf32>
    %28 = vector.broadcast %9 : vector<1x64xf32> to vector<8x64xf32>
    %29 = arith.addf %27, %28 : vector<8x64xf32>
    %c0_10 = arith.constant 0 : index
    %c0_11 = arith.constant 0 : index
    %30 = vector.load %arg6[%c0_10, %c0_11] : memref<64x64xf32, #tpu.memory_space<vmem>>, vector<64x64xf32>
    %cst_12 = arith.constant dense<0.000000e+00> : vector<8x64xf32>
    %31 = tpu.matmul %29, %30, %cst_12 {dimension_numbers = #tpu.dot_dimension_numbers<[1], [0], [0], [1], [0, 0, 1, 1], [], []>} : vector<8x64xf32>, vector<64x64xf32>, vector<8x64xf32> -> vector<8x64xf32>
    %c0_13 = arith.constant 0 : index
    %c0_14 = arith.constant 0 : index
    %32 = vector.load %arg7[%c0_13, %c0_14] : memref<1x64xf32, #tpu.memory_space<vmem>>, vector<1x64xf32>
    %33 = vector.broadcast %32 : vector<1x64xf32> to vector<8x64xf32>
    %34 = arith.addf %31, %33 : vector<8x64xf32>
    %35 = vector.shape_cast %34 : vector<8x64xf32> to vector<8x4x16xf32>
    %36 = tpu.transpose %35, [1, 0, 2] : vector<8x4x16xf32> -> vector<4x8x16xf32>
    %cst_15 = arith.constant -1.000000e+30 : f32
    %37 = vector.broadcast %cst_15 : f32 to vector<4x8x1xf32>
    %cst_16 = arith.constant 0.000000e+00 : f32
    %38 = vector.broadcast %cst_16 : f32 to vector<4x8x1xf32>
    %cst_17 = arith.constant 0.000000e+00 : f32
    %39 = vector.broadcast %cst_17 : f32 to vector<4x8x16xf32>
    %c0_i32_18 = arith.constant 0 : i32
    %c2_i32 = arith.constant 2 : i32
    %40 = arith.addi %c0_i32_18, %c2_i32 : i32
    %c1_i32 = arith.constant 1 : i32
    %41:3 = scf.for %arg23 = %c0_i32_18 to %40 step %c1_i32 iter_args(%arg24 = %37, %arg25 = %38, %arg26 = %39) -> (vector<4x8x1xf32>, vector<4x8x1xf32>, vector<4x8x16xf32>)  : i32 {
      %c8_i32_48 = arith.constant 8 : i32
      %91 = arith.muli %arg23, %c8_i32_48 : i32
      %92 = tpu.assume_multiple %91, 8 : i32
      %c0_49 = arith.constant 0 : index
      %93 = arith.index_cast %92 : i32 to index
      %c0_50 = arith.constant 0 : index
      %94 = vector.load %arg21[%c0_49, %93, %c0_50] : memref<4x16x16xf32, #tpu.memory_space<vmem>>, vector<4x8x16xf32>
      %c0_51 = arith.constant 0 : index
      %95 = arith.index_cast %92 : i32 to index
      %c0_52 = arith.constant 0 : index
      %96 = vector.load %arg22[%c0_51, %95, %c0_52] : memref<4x16x16xf32, #tpu.memory_space<vmem>>, vector<4x8x16xf32>
      "tpu.trace_start"() <{level = 10 : i32, message = "hqd,hkd->hqk"}> : () -> ()
      %cst_53 = arith.constant dense<0.000000e+00> : vector<4x8x8xf32>
      %97 = tpu.matmul %36, %94, %cst_53 {dimension_numbers = #tpu.dot_dimension_numbers<[2], [2], [1], [1], [0, 0, 0, 1, 1, 1], [0], [0]>} : vector<4x8x16xf32>, vector<4x8x16xf32>, vector<4x8x8xf32> -> vector<4x8x8xf32>
      "tpu.trace_stop"() : () -> ()
      %c0_54 = arith.constant 0 : index
      %98 = arith.index_cast %arg23 : i32 to index
      %c0_55 = arith.constant 0 : index
      %c0_56 = arith.constant 0 : index
      %99 = vector.load %arg3[%c0_54, %98, %c0_55, %c0_56] : memref<1x2x1x8xf32, #tpu.memory_space<vmem>>, vector<1x1x1x8xf32>
      %100 = vector.shape_cast %99 : vector<1x1x1x8xf32> to vector<1x8xf32>
      %101 = vector.shape_cast %100 : vector<1x8xf32> to vector<1x1x8xf32>
      %102 = vector.broadcast %101 : vector<1x1x8xf32> to vector<4x8x8xf32>
      %103 = arith.addf %97, %102 : vector<4x8x8xf32>
      %cst_57 = arith.constant dense<0xFF800000> : vector<4x8xf32>
      %104 = vector.multi_reduction <maximumf>, %103, %cst_57 [2] : vector<4x8x8xf32> to vector<4x8xf32>
      %105 = vector.shape_cast %104 : vector<4x8xf32> to vector<4x8x1xf32>
      %106 = arith.maximumf %arg24, %105 : vector<4x8x1xf32>
      %107 = arith.subf %arg24, %106 : vector<4x8x1xf32>
      %108 = math.exp %107 : vector<4x8x1xf32>
      %109 = vector.broadcast %106 : vector<4x8x1xf32> to vector<4x8x8xf32>
      %110 = arith.subf %103, %109 : vector<4x8x8xf32>
      %111 = math.exp %110 : vector<4x8x8xf32>
      %112 = arith.mulf %108, %arg25 : vector<4x8x1xf32>
      %cst_58 = arith.constant dense<0.000000e+00> : vector<4x8xf32>
      %113 = vector.multi_reduction <add>, %111, %cst_58 [2] : vector<4x8x8xf32> to vector<4x8xf32>
      %114 = vector.shape_cast %113 : vector<4x8xf32> to vector<4x8x1xf32>
      %115 = arith.addf %112, %114 : vector<4x8x1xf32>
      "tpu.trace_start"() <{level = 10 : i32, message = "hqk,hkd->hqd"}> : () -> ()
      %cst_59 = arith.constant dense<0.000000e+00> : vector<4x8x16xf32>
      %116 = tpu.matmul %111, %96, %cst_59 {dimension_numbers = #tpu.dot_dimension_numbers<[2], [1], [1], [2], [0, 0, 0, 1, 1, 2], [0], [0]>} : vector<4x8x8xf32>, vector<4x8x16xf32>, vector<4x8x16xf32> -> vector<4x8x16xf32>
      "tpu.trace_stop"() : () -> ()
      %117 = vector.broadcast %108 : vector<4x8x1xf32> to vector<4x8x16xf32>
      %118 = arith.mulf %117, %arg26 : vector<4x8x16xf32>
      %119 = arith.addf %118, %116 : vector<4x8x16xf32>
      scf.yield %106, %115, %119 : vector<4x8x1xf32>, vector<4x8x1xf32>, vector<4x8x16xf32>
    }
    %c2_i32_19 = arith.constant 2 : i32
    %42 = tpu.reciprocal %41#1 : vector<4x8x1xf32> -> vector<4x8x1xf32>
    %43 = vector.broadcast %42 : vector<4x8x1xf32> to vector<4x8x16xf32>
    %44 = arith.mulf %41#2, %43 : vector<4x8x16xf32>
    %45 = tpu.transpose %44, [1, 0, 2] : vector<4x8x16xf32> -> vector<8x4x16xf32>
    %46 = vector.shape_cast %45 : vector<8x4x16xf32> to vector<8x64xf32>
    %c0_20 = arith.constant 0 : index
    %c0_21 = arith.constant 0 : index
    %47 = vector.load %arg12[%c0_20, %c0_21] : memref<64x64xf32, #tpu.memory_space<vmem>>, vector<64x64xf32>
    %cst_22 = arith.constant dense<0.000000e+00> : vector<8x64xf32>
    %48 = tpu.matmul %46, %47, %cst_22 {dimension_numbers = #tpu.dot_dimension_numbers<[1], [0], [0], [1], [0, 0, 1, 1], [], []>} : vector<8x64xf32>, vector<64x64xf32>, vector<8x64xf32> -> vector<8x64xf32>
    %c0_23 = arith.constant 0 : index
    %c0_24 = arith.constant 0 : index
    %49 = vector.load %arg13[%c0_23, %c0_24] : memref<1x64xf32, #tpu.memory_space<vmem>>, vector<1x64xf32>
    %50 = vector.broadcast %49 : vector<1x64xf32> to vector<8x64xf32>
    %51 = arith.addf %48, %50 : vector<8x64xf32>
    %52 = arith.addf %51, %7 : vector<8x64xf32>
    %c0_25 = arith.constant 0 : index
    %c0_26 = arith.constant 0 : index
    %53 = vector.load %arg14[%c0_25, %c0_26] : memref<1x64xf32, #tpu.memory_space<vmem>>, vector<1x64xf32>
    %c0_27 = arith.constant 0 : index
    %c0_28 = arith.constant 0 : index
    %54 = vector.load %arg15[%c0_27, %c0_28] : memref<1x64xf32, #tpu.memory_space<vmem>>, vector<1x64xf32>
    %cst_29 = arith.constant dense<0.000000e+00> : vector<8xf32>
    %55 = vector.multi_reduction <add>, %52, %cst_29 [1] : vector<8x64xf32> to vector<8xf32>
    %56 = vector.shape_cast %55 : vector<8xf32> to vector<8x1xf32>
    %cst_30 = arith.constant 6.400000e+01 : f32
    %57 = vector.broadcast %cst_30 : f32 to vector<8x1xf32>
    %58 = arith.divf %56, %57 : vector<8x1xf32>
    %59 = vector.broadcast %58 : vector<8x1xf32> to vector<8x64xf32>
    %60 = arith.subf %52, %59 : vector<8x64xf32>
    %61 = arith.mulf %60, %60 : vector<8x64xf32>
    %cst_31 = arith.constant dense<0.000000e+00> : vector<8xf32>
    %62 = vector.multi_reduction <add>, %61, %cst_31 [1] : vector<8x64xf32> to vector<8xf32>
    %63 = vector.shape_cast %62 : vector<8xf32> to vector<8x1xf32>
    %cst_32 = arith.constant 6.400000e+01 : f32
    %64 = vector.broadcast %cst_32 : f32 to vector<8x1xf32>
    %65 = arith.divf %63, %64 : vector<8x1xf32>
    %cst_33 = arith.constant 9.99999997E-7 : f32
    %66 = vector.broadcast %cst_33 : f32 to vector<8x1xf32>
    %67 = arith.addf %65, %66 : vector<8x1xf32>
    %68 = math.rsqrt %67 : vector<8x1xf32>
    %69 = vector.broadcast %68 : vector<8x1xf32> to vector<8x64xf32>
    %70 = arith.mulf %60, %69 : vector<8x64xf32>
    %71 = vector.broadcast %53 : vector<1x64xf32> to vector<8x64xf32>
    %72 = arith.mulf %70, %71 : vector<8x64xf32>
    %73 = vector.broadcast %54 : vector<1x64xf32> to vector<8x64xf32>
    %74 = arith.addf %72, %73 : vector<8x64xf32>
    %c0_34 = arith.constant 0 : index
    %c0_35 = arith.constant 0 : index
    %75 = vector.load %arg16[%c0_34, %c0_35] : memref<64x128xf32, #tpu.memory_space<vmem>>, vector<64x128xf32>
    %cst_36 = arith.constant dense<0.000000e+00> : vector<8x128xf32>
    %76 = tpu.matmul %74, %75, %cst_36 {dimension_numbers = #tpu.dot_dimension_numbers<[1], [0], [0], [1], [0, 0, 1, 1], [], []>} : vector<8x64xf32>, vector<64x128xf32>, vector<8x128xf32> -> vector<8x128xf32>
    %c0_37 = arith.constant 0 : index
    %c0_38 = arith.constant 0 : index
    %77 = vector.load %arg17[%c0_37, %c0_38] : memref<1x128xf32, #tpu.memory_space<vmem>>, vector<1x128xf32>
    %78 = vector.broadcast %77 : vector<1x128xf32> to vector<8x128xf32>
    %79 = arith.addf %76, %78 : vector<8x128xf32>
    %cst_39 = arith.constant 0.000000e+00 : f32
    %80 = vector.broadcast %cst_39 : f32 to vector<8x128xf32>
    %81 = arith.maximumf %79, %80 : vector<8x128xf32>
    %c0_40 = arith.constant 0 : index
    %c0_41 = arith.constant 0 : index
    %82 = vector.load %arg18[%c0_40, %c0_41] : memref<128x64xf32, #tpu.memory_space<vmem>>, vector<128x64xf32>
    %cst_42 = arith.constant dense<0.000000e+00> : vector<8x64xf32>
    %83 = tpu.matmul %81, %82, %cst_42 {dimension_numbers = #tpu.dot_dimension_numbers<[1], [0], [0], [1], [0, 0, 1, 1], [], []>} : vector<8x128xf32>, vector<128x64xf32>, vector<8x64xf32> -> vector<8x64xf32>
    %c0_43 = arith.constant 0 : index
    %c0_44 = arith.constant 0 : index
    %84 = vector.load %arg19[%c0_43, %c0_44] : memref<1x64xf32, #tpu.memory_space<vmem>>, vector<1x64xf32>
    %85 = vector.broadcast %84 : vector<1x64xf32> to vector<8x64xf32>
    %86 = arith.addf %83, %85 : vector<8x64xf32>
    %87 = arith.addf %86, %52 : vector<8x64xf32>
    %c0_45 = arith.constant 0 : index
    %c0_46 = arith.constant 0 : index
    %c0_47 = arith.constant 0 : index
    %88 = vector.load %arg20[%c0_45, %c0_46, %c0_47] : memref<1x8x64xf32, #tpu.memory_space<vmem>>, vector<1x8x64xf32>
    %89 = vector.shape_cast %88 : vector<1x8x64xf32> to vector<8x64xf32>
    %90 = vector.shape_cast %87 : vector<8x64xf32> to vector<1x8x64xf32>
    tpu.vector_store %arg20[%c0_45, %c0_46, %c0_47], %90 {strides = array<i32>} : memref<1x8x64xf32, #tpu.memory_space<vmem>>, vector<1x8x64xf32>,
    return
  }
  func.func @transform_0(%arg0: i32, %arg1: i32) -> (i32, i32, i32) {
    %c0_i32 = arith.constant 0 : i32
    %c0_i32_0 = arith.constant 0 : i32
    %c0_i32_1 = arith.constant 0 : i32
    return %arg0, %c0_i32, %c0_i32_0 : i32, i32, i32
  }
  func.func @transform_1(%arg0: i32, %arg1: i32) -> (i32, i32, i32, i32) {
    %c0_i32 = arith.constant 0 : i32
    %c0_i32_0 = arith.constant 0 : i32
    %c0_i32_1 = arith.constant 0 : i32
    %c0_i32_2 = arith.constant 0 : i32
    return %arg0, %c0_i32, %c0_i32_0, %c0_i32_1 : i32, i32, i32, i32
  }
  func.func @transform_2(%arg0: i32, %arg1: i32) -> (i32, i32) {
    %c0_i32 = arith.constant 0 : i32
    %c0_i32_0 = arith.constant 0 : i32
    %c0_i32_1 = arith.constant 0 : i32
    return %c0_i32, %c0_i32_0 : i32, i32
  }
  func.func @transform_3(%arg0: i32, %arg1: i32) -> (i32, i32) {
    %c0_i32 = arith.constant 0 : i32
    %c0_i32_0 = arith.constant 0 : i32
    %c0_i32_1 = arith.constant 0 : i32
    return %c0_i32, %c0_i32_0 : i32, i32
  }
  func.func @transform_4(%arg0: i32, %arg1: i32) -> (i32, i32) {
    %c0_i32 = arith.constant 0 : i32
    %c0_i32_0 = arith.constant 0 : i32
    %c0_i32_1 = arith.constant 0 : i32
    return %c0_i32, %c0_i32_0 : i32, i32
  }
  func.func @transform_5(%arg0: i32, %arg1: i32) -> (i32, i32) {
    %c0_i32 = arith.constant 0 : i32
    %c0_i32_0 = arith.constant 0 : i32
    %c0_i32_1 = arith.constant 0 : i32
    return %c0_i32, %c0_i32_0 : i32, i32
  }
  func.func @transform_6(%arg0: i32, %arg1: i32) -> (i32, i32) {
    %c0_i32 = arith.constant 0 : i32
    %c0_i32_0 = arith.constant 0 : i32
    %c0_i32_1 = arith.constant 0 : i32
    return %c0_i32, %c0_i32_0 : i32, i32
  }
  func.func @transform_7(%arg0: i32, %arg1: i32) -> (i32, i32) {
    %c0_i32 = arith.constant 0 : i32
    %c0_i32_0 = arith.constant 0 : i32
    %c0_i32_1 = arith.constant 0 : i32
    return %c0_i32, %c0_i32_0 : i32, i32
  }
  func.func @transform_8(%arg0: i32, %arg1: i32) -> (i32, i32) {
    %c0_i32 = arith.constant 0 : i32
    %c0_i32_0 = arith.constant 0 : i32
    %c0_i32_1 = arith.constant 0 : i32
    return %c0_i32, %c0_i32_0 : i32, i32
  }
  func.func @transform_9(%arg0: i32, %arg1: i32) -> (i32, i32) {
    %c0_i32 = arith.constant 0 : i32
    %c0_i32_0 = arith.constant 0 : i32
    %c0_i32_1 = arith.constant 0 : i32
    return %c0_i32, %c0_i32_0 : i32, i32
  }
  func.func @transform_10(%arg0: i32, %arg1: i32) -> (i32, i32) {
    %c0_i32 = arith.constant 0 : i32
    %c0_i32_0 = arith.constant 0 : i32
    %c0_i32_1 = arith.constant 0 : i32
    return %c0_i32, %c0_i32_0 : i32, i32
  }
  func.func @transform_11(%arg0: i32, %arg1: i32) -> (i32, i32) {
    %c0_i32 = arith.constant 0 : i32
    %c0_i32_0 = arith.constant 0 : i32
    %c0_i32_1 = arith.constant 0 : i32
    return %c0_i32, %c0_i32_0 : i32, i32
  }
  func.func @transform_12(%arg0: i32, %arg1: i32) -> (i32, i32) {
    %c0_i32 = arith.constant 0 : i32
    %c0_i32_0 = arith.constant 0 : i32
    %c0_i32_1 = arith.constant 0 : i32
    return %c0_i32, %c0_i32_0 : i32, i32
  }
  func.func @transform_13(%arg0: i32, %arg1: i32) -> (i32, i32) {
    %c0_i32 = arith.constant 0 : i32
    %c0_i32_0 = arith.constant 0 : i32
    %c0_i32_1 = arith.constant 0 : i32
    return %c0_i32, %c0_i32_0 : i32, i32
  }
  func.func @transform_14(%arg0: i32, %arg1: i32) -> (i32, i32) {
    %c0_i32 = arith.constant 0 : i32
    %c0_i32_0 = arith.constant 0 : i32
    %c0_i32_1 = arith.constant 0 : i32
    return %c0_i32, %c0_i32_0 : i32, i32
  }
  func.func @transform_15(%arg0: i32, %arg1: i32) -> (i32, i32) {
    %c0_i32 = arith.constant 0 : i32
    %c0_i32_0 = arith.constant 0 : i32
    %c0_i32_1 = arith.constant 0 : i32
    return %c0_i32, %c0_i32_0 : i32, i32
  }
  func.func @transform_16(%arg0: i32, %arg1: i32) -> (i32, i32) {
    %c0_i32 = arith.constant 0 : i32
    %c0_i32_0 = arith.constant 0 : i32
    %c0_i32_1 = arith.constant 0 : i32
    return %c0_i32, %c0_i32_0 : i32, i32
  }
  func.func @transform_17(%arg0: i32, %arg1: i32) -> (i32, i32) {
    %c0_i32 = arith.constant 0 : i32
    %c0_i32_0 = arith.constant 0 : i32
    %c0_i32_1 = arith.constant 0 : i32
    return %c0_i32, %c0_i32_0 : i32, i32
  }
  func.func @transform_18(%arg0: i32, %arg1: i32) -> (i32, i32, i32) {
    %c0_i32 = arith.constant 0 : i32
    %c0_i32_0 = arith.constant 0 : i32
    return %arg0, %arg1, %c0_i32 : i32, i32, i32
  }
}

</mosaic_0001>

<bundles_post_ra>
// kernel: tpu_custom_call.1
= control target key start
LH: loop header
LB: loop body
LE: loop exit
PB: predicated region body
PF: predicated region fallthrough
CT: control target
= control target key end

     0   :  { %s4270_s0 = inlined_call_operand.hbm [shape: f32[2,16,64], index: 0, kind: input, shape index: {}]   ;;  %s4271_s1 = inlined_call_operand.hbm [shape: f32[2,2,1,8], index: 1, kind: input, shape index: {}]   ;;  %s4272_s2 = inlined_call_operand.hbm [shape: f32[1,64], index: 2, kind: input, shape index: {}]   ;;  %s4273_s3 = inlined_call_operand.vmem [shape: f32[1,64], index: 3, kind: input, shape index: {}]   ;;  %s4274_s4 = inlined_call_operand.vmem [shape: f32[64,64], index: 4, kind: input, shape index: {}]   ;;  %s4275_s5 = inlined_call_operand.vmem [shape: f32[1,64], index: 5, kind: input, shape index: {}]   ;;  %s4276_s6 = inlined_call_operand.vmem [shape: f32[64,64], index: 6, kind: input, shape index: {}]   ;;  %s4277_s7 = inlined_call_operand.vmem [shape: f32[1,64], index: 7, kind: input, shape index: {}]   ;;  %s4278_s8 = inlined_call_operand.vmem [shape: f32[64,64], index: 8, kind: input, shape index: {}]   ;;  %s4279_s9 = inlined_call_operand.vmem [shape: f32[1,64], index: 9, kind: input, shape index: {}]   ;;  %s4280_s10 = inlined_call_operand.hbm [shape: f32[64,64], index: 10, kind: input, shape index: {}]   ;;  %s4281_s11 = inlined_call_operand.vmem [shape: f32[1,64], index: 11, kind: input, shape index: {}]   ;;  %s4282_s12 = inlined_call_operand.vmem [shape: f32[1,64], index: 12, kind: input, shape index: {}]   ;;  %s4283_s13 = inlined_call_operand.vmem [shape: f32[1,64], index: 13, kind: input, shape index: {}]   ;;  %s4284_s14 = inlined_call_operand.hbm [shape: f32[64,128], index: 14, kind: input, shape index: {}]   ;;  %s4285_s15 = inlined_call_operand.vmem [shape: f32[1,128], index: 15, kind: input, shape index: {}]   ;;  %s4286_s16 = inlined_call_operand.vmem [shape: f32[128,64], index: 16, kind: input, shape index: {}]   ;;  %s4287_s17 = inlined_call_operand.vmem [shape: f32[1,64], index: 17, kind: input, shape index: {}]   ;;  %s4288_s18 = inlined_call_operand.hbm [shape: f32[2,16,64], index: 18, kind: output, shape index: {}]  }
   0x1   :  { %4302 = sst [smem:[#allocation29_spill]] %s4270_s0 }
   0x2   :  { %4303 = sst [smem:[#allocation30_spill]] %s4271_s1 }
   0x3   :  { %4304 = sst [smem:[#allocation31_spill]] %s4272_s2 }
   0x4   :  { %4305 = sst [smem:[#allocation32_spill]] %s4273_s3 }
   0x5   :  { %4306 = sst [smem:[#allocation33_spill]] %s4274_s4 }
   0x6   :  { %4307 = sst [smem:[#allocation34_spill]] %s4275_s5 }
   0x7   :  { %4308 = sst [smem:[#allocation35_spill]] %s4277_s7 }
   0x8   :  { %4309 = sst [smem:[#allocation36_spill]] %s4279_s9 }
   0x9   :  { %4310 = sst [smem:[#allocation37_spill]] %s4280_s10 }
   0xa   :  { %4311 = sst [smem:[#allocation38_spill]] %s4281_s11 }
   0xb   :  { %4312 = sst [smem:[#allocation39_spill]] %s4282_s12 }
   0xc   :  { %4313 = sst [smem:[#allocation40_spill]] %s4283_s13 }
   0xd   :  { %4314 = sst [smem:[#allocation41_spill]] %s4284_s14 }
   0xe   :  { %4315 = sst [smem:[#allocation42_spill]] %s4285_s15 }
   0xf   :  { %4316 = sst [smem:[#allocation43_spill]] %s4286_s16 }
  0x10   :  { %4317 = sst [smem:[#allocation44_spill]] %s4287_s17 }
  0x11   :  { %4318 = sst [smem:[#allocation45_spill]] %s4288_s18 }
  0x12   :  { %23 = vsyncpa [#allocation5], 0 }
  0x13   :  { %25 = vsyncpa [#allocation5 + $0x1], 0 }
  0x14   :  { %26 = vsyncpa [#allocation8], 0 }
  0x15   :  { %28 = vsyncpa [#allocation8 + $0x1], 0 }
  0x16   :  { %29 = vsyncpa [#allocation11], 0 }
  0x17   :  { %30 = vsyncpa [#allocation6], 0 }
  0x18   :  { %32 = vsyncpa [#allocation6 + $0x1], 0  ;;  %s3255_s27 = smov 0   ;;  %s3257_s28 = smov 0  }
  0x19   :  { %s3259_s29 = smov 0   ;;  %s3261_s30 = smov 0  }
  0x1a   :  { %s3263_s0 = smov 0   ;;  %s3265_s19 = smov 0  }
  0x1b   :  { %s3267_s1 = smov 0   ;;  %s3269_s20 = smov 0  }
  0x1c   :  { %s3271_s21 = smov 0   ;;  %s3273_s22 = smov 0  }
  0x1d   :  { %s3275_s2 = smov 0  }
  0x1e LB: > { %4319 = sst [smem:[#allocation19_spill]] %s3044_s27  ;;  %s3309_s23 = sadd.s32 4294967295, %s3084_s2   ;;  %s3084_s2 = sphi %s3275_s2, %s38_s2   ;;  %s3080_s22 = sphi %s3273_s22, %s4404_s22   ;;  %s3076_s21 = sphi %s3271_s21, %s4403_s21   ;;  %s3072_s20 = sphi %s3269_s20, %s4402_s20   ;;  %s3068_s1 = sphi %s3267_s1, %s4394_s1   ;;  %s3064_s19 = sphi %s3265_s19, %s4393_s19   ;;  %s3060_s0 = sphi %s3263_s0, %s4401_s0   ;;  %s3056_s30 = sphi %s3261_s30, %s4400_s30   ;;  %s3052_s29 = sphi %s3259_s29, %s4399_s29   ;;  %s3048_s28 = sphi %s3257_s28, %s4398_s28   ;;  %s3044_s27 = sphi %s3255_s27, %s4397_s27  }
  0x1f   : > { %4320 = sst [smem:[#allocation20_spill]] %s3064_s19  ;;  %s2376_s24 = sadd.s32 4294967294, %s3084_s2  }
  0x20   : > { %4321 = sst [smem:[#allocation21_spill]] %s3072_s20  ;;  %p70_p0 = scmp.ne.s32.totalorder %s3060_s0, %s3056_s30 }
  0x21   : > { %4322 = sst [smem:[#allocation22_spill]] %s3076_s21  ;;  %p71_p1 = scmp.eq.s32.totalorder %s3309_s23, 0 }
  0x22   : > { %p457_p2 = scmp.ne.s32.totalorder %s3052_s29, %s3048_s28  ;;  %p458_p4 = scmp.eq.s32.totalorder %s3309_s23, 3 }
  0x23   : > { %p3319_p3 = por %p71_p1, %p70_p0  ;;  %p463_p5 = scmp.ne.s32.totalorder %s3048_s28, %s3044_s27 }
  0x24   : > { %p464_p6 = scmp.eq.s32.totalorder %s2376_s24, 3  ;;  %p3326_p7 = por %p458_p4, %p457_p2 }
  0x25   : > { %p2377_p8 = scmp.ge.s32.totalorder %s3084_s2, 1  ;;  %p471_p10 = scmp.lt.s32.totalorder %s3084_s2, 5 }
  0x26   : > { %s4324_s18 = scalar_select %p3326_p7, 1, 0 }
  0x27   : > { %p3331_p9 = por %p464_p6, %p463_p5  ;;  %s4328_s15 = sld [smem:[#allocation31_spill]] }
  0x28   : > { %4325 = sst [smem:[#allocation23_spill]] %s4324_s18  ;;  %p3339_p11 = pnand %p2377_p8, %p471_p10 }
  0x29   : > { %s4326_s17 = scalar_select %p3331_p9, 1, 0 }
  0x2a   : > { %p2456_p12 = pneg %p3339_p11  ;;  %s3138_s24 = smov [#allocation9]  }
  0x2b   : > { %4327 = sst [smem:[#allocation24_spill]] %s4326_s17  ;;  %s485_s27 = sshll.u32 %s3138_s24, 4  ;;  %s486_s27 = int_to_ptr.vmem [resolvable:$true] %s485_s27 }
  0x2c   : > { %s4330_s10 = sld [smem:[#allocation37_spill]]  ;;  %p3350_p13 = pnand %p2456_p12, %p71_p1 }
  0x2d   : > { %s483_s20 = sshll.u32 %s4328_s15, 4  ;;  %s3139_s15 = smov [#allocation10]   ;;  %s484_s20 = int_to_ptr.hbm [resolvable:$true] %s483_s20 }
  0x2e   : > { %s517_s30 = sshll.u32 %s3139_s15, 4  ;;  %s4295_s12 = smov 128   ;;  %s518_s30 = int_to_ptr.vmem [resolvable:$true] %s517_s30 }
  0x2f   : > { %2459 = dma.hbm_to_vmem [thread:$0]  (!%p3350_p13), %s484_s20, 16, %s486_s27, [#allocation8]  }
  0x30   : > { %s4296_s18 = smov 8   ;;  %s4332_s14 = sld [smem:[#allocation41_spill]] }
  0x31   : > { %s3142_s15 = smov [#allocation12]   ;;  %s47_s20 = sadd.s32 1, %s3076_s21 }
  0x32   : > { %s515_s17 = sshll.u32 %s4330_s10, 4  ;;  %s540_s27 = sshll.u32 %s3142_s15, 4  ;;  %s516_s17 = int_to_ptr.hbm [resolvable:$true] %s515_s17  ;;  %s541_s27 = int_to_ptr.vmem [resolvable:$true] %s540_s27 }
  0x33   : > { %2462 = dma.hbm_to_vmem [thread:$0]  (!%p3350_p13), %s516_s17, 1024, %s518_s30, [#allocation11], %s4295_s12, %s4295_s12, %s4296_s18  }
  0x34   : > { %p48_p0 = scmp.ge.s32.totalorder %s47_s20, 2  ;;  %s50_s11 = sadd.s32 1, %s3080_s22 }
  0x35   : > { %s57_s17 = sadd.s32 1, %s3064_s19  ;;  %p64_p2 = scmp.ne.s32.totalorder %s3064_s19, %s3060_s0 }
  0x36   : > { %s538_s16 = sshll.u32 %s4332_s14, 4  ;;  %s4406_s20 = smov (%p48_p0, %s47_s20), 0  ;;  %s539_s16 = int_to_ptr.hbm [resolvable:$true] %s538_s16 }
  0x37   : > { %2465 = dma.hbm_to_vmem [thread:$0]  (!%p3350_p13), %s539_s16, 1024, %s541_s27, [#allocation11], %s4295_s12, %s4295_s12, %s4296_s18  }
  0x38   : > { %4333 = sst [smem:[#allocation25_spill]] %s4406_s20  ;;  %s4408_s11 = smov (!%p48_p0, %s50_s11), %s3080_s22 }
  0x39   : > { %p65_p4 = scmp.eq.s32.totalorder %s3084_s2, 0  ;;  %s443_s10 = ssub.s32 %s3076_s21, %s4406_s20 }
  0x3a   : > { %p52_p5 = scmp.ge.s32.totalorder %s4408_s11, 2  ;;  %p2480_p6 = scmp.lt.s32.totalorder %s3084_s2, 4 }
  0x3b   : > { %p3381_p8 = por %p65_p4, %p64_p2  ;;  %s563_s25 = sand.u32 1, %s3064_s19  }
  0x3c   : > { %s4410_s11 = smov (%p52_p5, %s4408_s11), 0  ;;  %s2382_s30 = sshll.u32 %s563_s25, 4 }
  0x3d   : > { %4335 = sst [smem:[#allocation26_spill]] %s4410_s11  ;;  %s54_s24 = ssub.s32 %s3080_s22, %s4410_s11 }
  0x3e   : > { %p55_p10 = scmp.eq.s32.totalorder %s54_s24, 0  ;;  %s444_s15 = sor.u32 %s443_s10, %s54_s24 }
  0x3f   : > { %p445_p12 = scmp.eq.s32.totalorder %s444_s15, 0  ;;  %s2421_s27 = sshll.u32 %s3080_s22, 4 }
  0x40   : > { %s3392_s12 = scalar_select %p55_p10, %s3064_s19, %s57_s17  }
  0x41   : > { %s4337_s18 = sadd.s32 1, %s3052_s29  ;;  %s4339_s5 = sld [smem:[#allocation29_spill]] }
  0x42   : > { %4336 = sst [smem:[#allocation27_spill]] %s3392_s12  ;;  %s567_s7 = scalar_lea.vmem [#allocation4], %s2382_s30 }
  0x43   : > { %s3397_s14 = scalar_select %p445_p12, %s3052_s29, %s4337_s18  }
  0x44   : > { %s575_s9 = sshll.u32 %s567_s7, 4  ;;  %p3406_p13 = pnand %p2480_p6, %p3381_p8  ;;  %s576_s9 = int_to_ptr.vmem [resolvable:$true] %s575_s9 }
  0x45   : > { %4338 = sst [smem:[#allocation28_spill]] %s3397_s14  ;;  %s585_s17 = sand.u32 1, %s3084_s2  }
  0x46   : > { %s2385_s18 = sshll.u32 %s563_s25, 1  ;;  %s564_s24 = scalar_lea.sflag [#allocation5], %s563_s25 }
  0x47   : > { %s572_s4 = scalar_lea.hbm %s4339_s5, %s2421_s27  ;;  %s4341_s15 = smov 8  }
  0x48   : > { %s573_s3 = sshll.u32 %s572_s4, 4  ;;  %s4342_s21 = smov 128   ;;  %s574_s3 = int_to_ptr.hbm [resolvable:$true] %s573_s3 }
  0x49   : > { %2469 = dma.hbm_to_vmem [thread:$0]  (!%p3406_p13), %s574_s3, 256, %s576_s9, %s564_s24, %s4342_s21, %s4342_s21, %s4341_s15  }
  0x4a   : > { %s2386_s5 = sshll.u32 %s3080_s22, 1  ;;  %s4343_s20 = sld [smem:[#allocation30_spill]] }
  0x4b   : > { %s589_s30 = scalar_lea.vmem [#allocation7], %s2385_s18  ;;  %s586_s12 = scalar_lea.sflag [#allocation8], %s585_s17 }
  0x4c   : > { %s596_s27 = sshll.u32 %s589_s30, 4  ;;  %s3143_s19 = smov 16   ;;  %s597_s27 = int_to_ptr.vmem [resolvable:$true] %s596_s27 }
  0x4d   : > { %s3144_s14 = smov 1   ;;  %s610_s3 = sand.u32 (!%p3339_p11), 1, %s3060_s0  }
  0x4e   : > { %608 = sbr.rel (%p3339_p11) target bundleno = 2472 (0x9a8), region = 92  ;;  %s2388_s9 = sshll.u32 (!%p3339_p11), %s610_s3, 4 }
  0x4f   : > { %s611_s25 = scalar_lea.sflag (!%p3339_p11), [#allocation5], %s610_s3  ;;  %s3425_s24 = scalar_lea.vmem (!%p3339_p11), [#allocation4], %s2388_s9 }
  0x50   : > { %s593_s16 = scalar_lea.hbm %s4343_s20, %s2386_s5 }
  0x51   : > { %s594_s11 = sshll.u32 %s593_s16, 4  ;;  %s595_s11 = int_to_ptr.hbm [resolvable:$true] %s594_s11 }
  0x52   : > { %2472 = dma.hbm_to_vmem [thread:$0]  (!%p3406_p13), %s595_s11, 32, %s597_s27, %s586_s12, %s3143_s19, %s3143_s19, %s3144_s14  }
  0x53   : > { %3023 = dma.done.wait (%p3319_p3), %s611_s25, 256  }
  0x54   : > { %3025 = vsyncadd (%p3319_p3), %s611_s25, 4294967040  ;;  %s620_s17 = sand.u32 1, %s3309_s23   ;;  %s2389_s10 = sshll.u32 %s610_s3, 1 }
  0x55   : > { %s621_s11 = scalar_lea.sflag [#allocation8], %s620_s17  ;;  %s3432_s14 = scalar_lea.vmem [#allocation7], %s2389_s10 }
  0x56   : > { %3027 = dma.done.wait (%p3319_p3), %s621_s11, 32  }
  0x57   : > { %3029 = vsyncadd (%p3319_p3), %s621_s11, 4294967264 }
  0x58   : > { %3031 = dma.done.wait (%p71_p1), [#allocation8], 16  }
  0x59   : > { %3033 = vsyncadd (%p71_p1), [#allocation8], 4294967280 }
  0x5a   : > { %3035 = dma.done.wait (%p71_p1), [#allocation11], 2048  }
  0x5b   : > { %3037 = vsyncadd (%p71_p1), [#allocation11], 4294965248  ;;  %s695_s13 = sand.u32 1, %s3048_s28   ;;  %p2394_p3 = scmp.ne.s32.totalorder %s3068_s1, 0 }
  0x5c   : > { %s3449_s19 = sshll.u32 %s695_s13, 3  ;;  %s4344_s10 = sld [smem:[#allocation32_spill]] (!%p2394_p3) }
  0x5d   : > { %s697_s26 = scalar_lea.vmem [#allocation13], %s3449_s19  ;;  %701 = sbr.rel (%p2394_p3) target bundleno = 684 (0x2ac), region = 116 }
  0x5e   : > { %s4345_s12 = sld [smem:[#allocation36_spill]] (!%p2394_p3)  ;;  %s3146_s5 = smov (!%p2394_p3), 96  }
  0x5f   : > { %s4346_s21 = sld [smem:[#allocation35_spill]] (!%p2394_p3)  ;;  %s3147_s4 = smov (!%p2394_p3), 112  }
  0x60   : > { %s3148_s7 = smov (!%p2394_p3), 80  }
  0x62   : > { %v703_v0 = vld [vmem:[%s3425_s24 + $0x8] sm:$0xff]  ;;  %vm706_vm0 = vcmask 523264   ;;  %v702_v2 = vld [vmem:[%s3425_s24] sm:$0xff]  ;;  %v3145_v4 = vmov 64.0   ;;  %vm865_vm8 = vcmask 1047556   ;;  %vm1085_vm9 = vcmask 130048  }
  0x63   : > { %v710_v1 = vsel %vm706_vm0, %v703_v0, 0.0  ;;  %v707_v3 = vsel %vm706_vm0, %v702_v2, 0.0  ;;  %2703 = vrcp.f32 %v3145_v4  ;;  %v775_v21 = vld [vmem:[%s4276_s6 + $0x38] sm:$0xff]  ;;  %v774_v23 = vld [vmem:[%s4276_s6 + $0x30] sm:$0xff]  ;;  %v773_v25 = vld [vmem:[%s4276_s6 + $0x28] sm:$0xff] }
  0x64   : > { %711 = vadd.xlane.f32.xlu0 %v710_v1  ;;  %v816_v22 = vld [vmem:[%s4278_s8 + $0x38] sm:$0xff]  ;;  %2422 = vmatpush.msra.mxu2 %v775_v21  ;;  %v815_v24 = vld [vmem:[%s4278_s8 + $0x30] sm:$0xff]  ;;  %v814_v26 = vld [vmem:[%s4278_s8 + $0x28] sm:$0xff] }
  0x65   : > { %2430 = vmatpush.msra.mxu3 %v816_v22  ;;  %794 = vmatpush.msra.mxu0 %v775_v21  ;;  %v772_v27 = vld [vmem:[%s4276_s6 + $0x20] sm:$0xff]  ;;  %v771_v29 = vld [vmem:[%s4276_s6 + $0x18] sm:$0xff]  ;;  %v770_v31 = vld [vmem:[%s4276_s6 + $0x10] sm:$0xff] }
  0x66   : > { %829 = vmatpush.msra.mxu1 %v816_v22  ;;  %2423 = vmatpush.msra.mxu2 %v774_v23  ;;  %v813_v28 = vld [vmem:[%s4278_s8 + $0x20] sm:$0xff]  ;;  %v812_v30 = vld [vmem:[%s4278_s8 + $0x18] sm:$0xff]  ;;  %v811_v32 = vld [vmem:[%s4278_s8 + $0x10] sm:$0xff] }
  0x67   : > { %2431 = vmatpush.msra.mxu3 %v815_v24  ;;  %795 = vmatpush.msra.mxu0 %v774_v23  ;;  %v769_v33 = vld [vmem:[%s4276_s6 + $0x8] sm:$0xff]  ;;  %v768_v35 = vld [vmem:[%s4276_s6] sm:$0xff] }
  0x68   : > { %830 = vmatpush.msra.mxu1 %v815_v24  ;;  %2424 = vmatpush.msra.mxu2 %v773_v25  ;;  %v810_v34 = vld [vmem:[%s4278_s8 + $0x8] sm:$0xff]  ;;  %v809_v36 = vld [vmem:[%s4278_s8] sm:$0xff] }
  0x69   : > { %v2704_v5 = vpop.eup %2703  ;;  %2432 = vmatpush.msra.mxu3 %v814_v26  ;;  %796 = vmatpush.msra.mxu0 %v773_v25  ;;  %v2699_v51 = vld [vmem:[#allocation9] ss:$0 sm:$0xff]  ;;  %v2700_v55 = vld [vmem:[%s4344_s10] ss:$0 sm:$0xff] }
  0x6a   : > { %v714_v6 = vmul.f32 64.0, %v2704_v5  ;;  %vm718_vm1 = vweird.f32 %v2704_v5  ;;  %831 = vmatpush.msra.mxu1 %v814_v26  ;;  %2425 = vmatpush.msra.mxu2 %v772_v27  ;;  %v2702_v1 = vld [vmem:[%s4345_s12] ss:$0 sm:$0xff] }
  0x6b   : > { %2433 = vmatpush.msra.mxu3 %v813_v28  ;;  %797 = vmatpush.msra.mxu0 %v772_v27 }
  0x6c   : > { %708 = vadd.xlane.f32.xlu0 %v707_v3  ;;  %v715_v7 = vsub.f32 1.0, %v714_v6  ;;  %832 = vmatpush.msra.mxu1 %v813_v28  ;;  %v2701_v3 = vld [vmem:[%s4346_s21] ss:$0 sm:$0xff] }
  0x6d   : > { %2426 = vmatpush.msra.mxu2 %v771_v29  ;;  %2434 = vmatpush.msra.mxu3 %v812_v30 }
  0x6e   : > { %v716_v8 = vmul.f32 %v2704_v5, %v715_v7  ;;  %798 = vmatpush.msra.mxu0 %v771_v29  ;;  %833 = vmatpush.msra.mxu1 %v812_v30 }
  0x6f   : > { %2427 = vmatpush.msra.mxu2 %v770_v31  ;;  %2435 = vmatpush.msra.mxu3 %v811_v32 }
  0x70   : > { %v717_v9 = vadd.f32 %v2704_v5, %v716_v8  ;;  %799 = vmatpush.msra.mxu0 %v770_v31  ;;  %834 = vmatpush.msra.mxu1 %v811_v32 }
  0x71   : > { %2428 = vmatpush.msra.mxu2 %v769_v33  ;;  %2436 = vmatpush.msra.mxu3 %v810_v34 }
  0x72   : > { %v3457_v10 = vsel %vm718_vm1, %v2704_v5, %v717_v9  ;;  %800 = vmatpush.msra.mxu0 %v769_v33  ;;  %835 = vmatpush.msra.mxu1 %v810_v34 }
  0x73   : > { %2429 = vmatpush.msra.mxu2 %v768_v35  ;;  %2437 = vmatpush.msra.mxu3 %v809_v36 }
  0x74   : > { %801 = vmatpush.msra.mxu0 %v768_v35  ;;  %836 = vmatpush.msra.mxu1 %v809_v36 }
  0xd7   : > { %v712_v11 = vpop.xlane.xlu0 %711 }
  0xd8   : > { %v721_v12 = vmul.f32 %v3457_v10, %v712_v11 }
  0xda   : > { %v3460_v13 = vsub.f32 %v703_v0, %v721_v12  ;;  %v3149_v12 = vmov 1983009808  }
  0xdc   : > { %v725_v14 = vmul.f32 %v3460_v13, %v3460_v13 }
  0xde   : > { %v729_v15 = vsel %vm706_vm0, %v725_v14, 0.0 }
  0xdf   : > { %730 = vadd.xlane.f32.xlu1 %v729_v15  ;;  %v709_v16 = vpop.xlane.xlu0 %708 }
  0xe0   : > { %v720_v17 = vmul.f32 %v3457_v10, %v709_v16 }
  0xe2   : > { %v3466_v18 = vsub.f32 %v702_v2, %v720_v17 }
  0xe4   : > { %v724_v19 = vmul.f32 %v3466_v18, %v3466_v18 }
  0xe6   : > { %v726_v20 = vsel %vm706_vm0, %v724_v19, 0.0 }
  0xe7   : > { %727 = vadd.xlane.f32.xlu1 %v726_v20  ;;  %v3150_v20 = vmov 1934713408  }
  0xe8   : > { %v894_v21 = vunpack.c.l.s4 %v3150_v20 }
  0xea   : > { %v3557_v26 = vunpack.c.0.s8 %v894_v21 }
 0x152   : > { %v731_v37 = vpop.xlane.xlu1 %730 }
 0x153   : > { %v733_v38 = vmul.f32 %v731_v37, %v3457_v10 }
 0x155   : > { %v735_v39 = vadd.f32 1e-06, %v733_v38 }
 0x157   : > { %2705 = vrsqrt.f32 %v735_v39  ;;  %vm752_vm3 = vweird.f32 %v735_v39 }
 0x15a   : > { %v728_v40 = vpop.xlane.xlu1 %727 }
 0x15b   : > { %v732_v41 = vmul.f32 %v728_v40, %v3457_v10 }
 0x15d   : > { %v2706_v42 = vpop.eup %2705  ;;  %v734_v43 = vadd.f32 1e-06, %v732_v41 }
 0x15e   : > { %v747_v44 = vmul.f32 %v2706_v42, %v735_v39  ;;  %vm753_vm2 = vweird.f32 %v2706_v42 }
 0x15f   : > { %2707 = vrsqrt.f32 %v734_v43  ;;  %vm754_vm4 = vmor %vm752_vm3, %vm753_vm2  ;;  %vm742_vm6 = vweird.f32 %v734_v43 }
 0x160   : > { %v748_v45 = vmul.f32 %v2706_v42, %v747_v44 }
 0x162   : > { %v749_v46 = vmul.f32 0.5, %v748_v45 }
 0x164   : > { %v750_v47 = vsub.f32 1.5, %v749_v46 }
 0x165   : > { %v2708_v48 = vpop.eup %2707 }
 0x166   : > { %v751_v49 = vmul.f32 %v2706_v42, %v750_v47  ;;  %v737_v50 = vmul.f32 %v2708_v48, %v734_v43  ;;  %vm743_vm5 = vweird.f32 %v2708_v48 }
 0x167   : > { %vm744_vm7 = vmor %vm742_vm6, %vm743_vm5 }
 0x168   : > { %v755_v52 = vsel %vm754_vm4, %v2706_v42, %v751_v49  ;;  %v738_v53 = vmul.f32 %v2708_v48, %v737_v50 }
 0x169   : > { %v757_v54 = vmul.f32 %v755_v52, %v3460_v13  ;;  %v870_v13 = vunpack.c.l.s4 %v3149_v12 }
 0x16a   : > { %v739_v56 = vmul.f32 0.5, %v738_v53 }
 0x16b   : > { %v762_v57 = vmul.f32 %v2699_v51, %v757_v54  ;;  %v3551_v17 = vunpack.c.0.s8 %v870_v13 }
 0x16c   : > { %v740_v58 = vsub.f32 1.5, %v739_v56 }
 0x16d   : > { %v767_v59 = vadd.f32 %v2700_v55, %v762_v57 }
 0x16e   : > { %v741_v60 = vmul.f32 %v2708_v48, %v740_v58 }
 0x16f   : > { %2396 = vmatmul.msk.f32.vlgmr.msra.gmra.mxu2 %vm706_vm0, %v767_v59  ;;  %2398 = vmatmul.msk.f32.vlgmr.msra.gmra.mxu3 %vm706_vm0, %v767_v59 }
 0x170   : > { %v745_v61 = vsel %vm744_vm7, %v2708_v48, %v741_v60 }
 0x171   : > { %v756_v62 = vmul.f32 %v745_v61, %v3466_v18 }
 0x173   : > { %v761_v63 = vmul.f32 %v2699_v51, %v756_v62 }
 0x175   : > { %v766_v0 = vadd.f32 %v2700_v55, %v761_v63 }
 0x177   : > { %2395 = vmatmul.msk.f32.vlgmr.msra.gmra.mxu0 %vm706_vm0, %v766_v0  ;;  %2397 = vmatmul.msk.f32.vlgmr.msra.gmra.mxu1 %vm706_vm0, %v766_v0 }
 0x1f2   : > { %v841_v2 = vpop.f32.mrf.mxu3  ;;  %v806_v9 = vpop.f32.mrf.mxu2 }
 0x1f3   : > { %v3536_v4 = vadd.f32 %v2702_v1, %v841_v2  ;;  %v3542_v10 = vadd.f32 %v2701_v3, %v806_v9 }
 0x1f4   : > { %v803_v5 = vpop.f32.mrf.mxu0  ;;  %v838_v6 = vpop.f32.mrf.mxu1 }
 0x1f5   : > { %v804_v7 = vadd.f32 %v2701_v3, %v803_v5  ;;  %v3538_v8 = vadd.f32 %v2702_v1, %v838_v6  ;;  %1104 = vrot.lane.b32.xlu1 %v3536_v4, %s3146_s5  ;;  %v1172_v5 = vrot.slane %v3536_v4, 4  ;;  %v923_v13 = vrot.slane %v3542_v10, 4 }
 0x1f7   : > { %1102 = vrot.lane.b32.xlu0 %v3538_v8, %s3146_s5  ;;  %852 = vrot.lane.b32.xlu2 %v804_v7, %s3146_s5  ;;  %v867_v16 = vrot.slane %v804_v7, 4 }
 0x1fd   : > { %1098 = vrot.lane.b32.xlu1 %v3536_v4, %s3147_s4 }
 0x1ff   : > { %860 = vrot.lane.b32.xlu0 %v3542_v10, %s3148_s7  ;;  %846 = vrot.lane.b32.xlu2 %v804_v7, %s3147_s4 }
 0x207   : > { %1108 = vrot.lane.b32.xlu0 %v3538_v8, %s3148_s7  ;;  %858 = vrot.lane.b32.xlu2 %v804_v7, %s3148_s7 }
 0x20f   : > { %1096 = vrot.lane.b32.xlu2 %v3538_v8, %s3147_s4 }
 0x217   : > { %854 = vrot.lane.b32.xlu2 %v3542_v10, %s3146_s5 }
 0x21f   : > { %848 = vrot.lane.b32.xlu2 %v3542_v10, %s3147_s4 }
 0x227   : > { %1110 = vrot.lane.b32.xlu2 %v3536_v4, %s3148_s7 }
 0x251   : > { %v853_v11 = vpop.permute.xlu2 %852 }
 0x252   : > { %v864_v15 = vrot.slane %v853_v11, 4  ;;  %v868_v18 = vsel %vm865_vm8, %v853_v11, %v867_v16  ;;  %v1116_v11 = vrot.slane %v3538_v8, 4 }
 0x253   : > { %v876_v22 = vperm.slane %v868_v18, %v3551_v17 }
 0x254   : > { %v866_v19 = vsel %vm865_vm8, %v864_v15, %v804_v7 }
 0x255   : > { %v872_v24 = vperm.slane %v866_v19, %v3551_v17  ;;  %v903_v29 = vrot.slane %v876_v22, 4 }
 0x257   : > { %v891_v32 = vrot.slane %v872_v24, 4 }
 0x259   : > { %v847_v14 = vpop.permute.xlu2 %846 }
 0x25a   : > { %v879_v23 = vrot.slane %v847_v14, 4 }
 0x261   : > { %v859_v25 = vpop.permute.xlu2 %858 }
 0x262   : > { %v877_v27 = vrot.slane %v859_v25, 4  ;;  %v880_v28 = vsel %vm865_vm8, %v859_v25, %v879_v23 }
 0x263   : > { %v888_v30 = vperm.slane %v880_v28, %v3551_v17 }
 0x264   : > { %v878_v31 = vsel %vm865_vm8, %v877_v27, %v847_v14 }
 0x265   : > { %v884_v33 = vperm.slane %v878_v31, %v3551_v17  ;;  %v901_v34 = vrot.slane %v888_v30, 4  ;;  %v904_v35 = vsel %vm865_vm8, %v888_v30, %v903_v29 }
 0x266   : > { %v912_v36 = vperm.slane %v904_v35, %v3557_v26 }
 0x267   : > { %v889_v37 = vrot.slane %v884_v33, 4  ;;  %v892_v38 = vsel %vm865_vm8, %v884_v33, %v891_v32  ;;  %v902_v39 = vsel %vm865_vm8, %v901_v34, %v876_v22  ;;  %v1105_v60 = vpop.permute.xlu1 %1104 }
 0x268   : > { %v900_v40 = vperm.slane %v892_v38, %v3557_v26  ;;  %v908_v41 = vperm.slane %v902_v39, %v3557_v26  ;;  %v919_v42 = vrot.slane %v912_v36, 4  ;;  %v1170_v6 = vrot.slane %v1105_v60, 4 }
 0x269   : > { %v890_v43 = vsel %vm865_vm8, %v889_v37, %v872_v24  ;;  %v1103_v44 = vpop.permute.xlu0 %1102  ;;  %v3570_v45 = vpop.permute.xlu2 %1096  ;;  %v1173_v22 = vsel %vm865_vm8, %v1105_v60, %v1172_v5 }
 0x26a   : > { %v896_v46 = vperm.slane %v890_v43, %v3557_v26  ;;  %v915_v47 = vrot.slane %v900_v40, 4  ;;  %v917_v48 = vrot.slane %v908_v41, 4  ;;  %v920_v49 = vsel %vm865_vm8, 0.0, %v919_v42 }
 0x26b   : > { %v988_v50 = vsel %vm865_vm8, %v919_v42, %v908_v41  ;;  %v993_v51 = vrot.slane %v920_v49, 4  ;;  %v1114_v9 = vrot.slane %v1103_v44, 4  ;;  %v1171_v25 = vsel %vm865_vm8, %v1170_v6, %v3536_v4 }
 0x26c   : > { %v913_v52 = vrot.slane %v896_v46, 4  ;;  %v916_v53 = vsel %vm865_vm8, 0.0, %v915_v47  ;;  %v918_v54 = vsel %vm865_vm8, 0.0, %v917_v48  ;;  %v977_v55 = vsel %vm865_vm8, %v915_v47, %v896_v46 }
 0x26d   : > { %v981_v56 = vperm.slane %v977_v55, %v3551_v17  ;;  %v982_v57 = vrot.slane %v916_v53, 4  ;;  %v992_v58 = vperm.slane %v988_v50, %v3551_v17  ;;  %v994_v59 = vsel %vm865_vm8, %v993_v51, %v918_v54 }
 0x26e   : > { %v914_v61 = vsel %vm865_vm8, 0.0, %v913_v52  ;;  %v998_v62 = vperm.slane %v994_v59, %v3551_v17  ;;  %v1117_v27 = vsel %vm865_vm8, %v1103_v44, %v1116_v11  ;;  %v1115_v31 = vsel %vm865_vm8, %v1114_v9, %v3538_v8 }
 0x26f   : > { %v983_v63 = vsel %vm865_vm8, %v982_v57, %v914_v61  ;;  %v1001_v0 = vrot.slane %v981_v56, 4  ;;  %v1013_v1 = vrot.slane %v992_v58, 4  ;;  %v3604_v33 = vperm.slane %v1173_v22, %v3551_v17  ;;  %v3614_v40 = vpop.permute.xlu1 %1098 }
 0x270   : > { %v987_v2 = vperm.slane %v983_v63, %v3551_v17  ;;  %v1011_v3 = vrot.slane %v998_v62, 4  ;;  %v1125_v38 = vperm.slane %v1117_v27, %v3551_v17  ;;  %v1121_v8 = vperm.slane %v1115_v31, %v3551_v17 }
 0x271   : > { %v1014_v7 = vsel %vm865_vm8, %v998_v62, %v1013_v1  ;;  %v861_v12 = vpop.permute.xlu0 %860  ;;  %v855_v14 = vpop.permute.xlu2 %854  ;;  %v1128_v39 = vrot.slane %v3570_v45, 4  ;;  %v3621_v44 = vperm.slane %v1171_v25, %v3551_v17  ;;  %v1184_v54 = vrot.slane %v3614_v40, 4 }
 0x272   : > { %v999_v15 = vrot.slane %v987_v2, 4  ;;  %v1002_v16 = vsel %vm865_vm8, %v987_v2, %v1001_v0  ;;  %v1012_v18 = vsel %vm865_vm8, %v1011_v3, %v992_v58  ;;  %v1022_v19 = vperm.slane %v1014_v7, %v3557_v26 }
 0x273   : > { %v1010_v20 = vperm.slane %v1002_v16, %v3557_v26  ;;  %v1018_v21 = vperm.slane %v1012_v18, %v3557_v26  ;;  %v921_v34 = vrot.slane %v855_v14, 4  ;;  %v924_v35 = vsel %vm865_vm8, %v855_v14, %v923_v13 }
 0x274   : > { %v1000_v23 = vsel %vm865_vm8, %v999_v15, %v981_v56  ;;  %v1027_v24 = vrot.slane %v1022_v19, 4  ;;  %v933_v41 = vrot.slane %v861_v12, 4  ;;  %v932_v47 = vperm.slane %v924_v35, %v3551_v17 }
 0x275   : > { %v1006_v28 = vperm.slane %v1000_v23, %v3557_v26  ;;  %v1023_v29 = vrot.slane %v1018_v21, 4  ;;  %v1029_v30 = vrot.slane %v1010_v20, 4  ;;  %v922_v42 = vsel %vm865_vm8, %v921_v34, %v3542_v10 }
 0x276   : > { %v1028_v32 = vsel %vm865_vm8, %v1027_v24, %v1010_v20  ;;  %v928_v46 = vperm.slane %v922_v42, %v3551_v17  ;;  %v1152_v53 = vrot.slane %v1125_v38, 4  ;;  %v1140_v57 = vrot.slane %v1121_v8, 4 }
 0x277   : > { %v1024_v36 = vsel %vm865_vm8, %v1023_v29, %v1006_v28  ;;  %v1025_v4 = vrot.slane %v1006_v28, 4  ;;  %v1030_v37 = vsel %vm865_vm8, %v1022_v19, %v1029_v30  ;;  %1090 = vst.msk [vmem:[#allocation2 + $0x20] sm:$0xff] %vm1085_vm9, %v1028_v32  ;;  %v959_v1 = vrot.slane %v932_v47, 4 }
 0x278   : > { %1086 = vst.msk [vmem:[#allocation2] sm:$0xff] %vm1085_vm9, %v1024_v36  ;;  %v947_v58 = vrot.slane %v928_v46, 4 }
 0x279   : > { %v1026_v43 = vsel %vm865_vm8, %v1018_v21, %v1025_v4  ;;  %1092 = vst.msk [vmem:[#allocation2 + $0x30] sm:$0xff] %vm1085_vm9, %v1030_v37  ;;  %v1109_v48 = vpop.permute.xlu0 %1108  ;;  %v849_v49 = vpop.permute.xlu2 %848 }
 0x27a   : > { %1088 = vst.msk [vmem:[#allocation2 + $0x10] sm:$0xff] %vm1085_vm9, %v1026_v43  ;;  %v1126_v50 = vrot.slane %v1109_v48, 4  ;;  %v1129_v51 = vsel %vm865_vm8, %v1109_v48, %v1128_v39  ;;  %v934_v10 = vsel %vm865_vm8, %v933_v41, %v849_v49  ;;  %v935_v52 = vrot.slane %v849_v49, 4 }
 0x27b   : > { %v1137_v55 = vperm.slane %v1129_v51, %v3551_v17  ;;  %v940_v56 = vperm.slane %v934_v10, %v3551_v17 }
 0x27c   : > { %v1127_v59 = vsel %vm865_vm8, %v1126_v50, %v3570_v45  ;;  %v936_v60 = vsel %vm865_vm8, %v861_v12, %v935_v52 }
 0x27d   : > { %v1133_v61 = vperm.slane %v1127_v59, %v3551_v17  ;;  %v1150_v62 = vrot.slane %v1137_v55, 4  ;;  %v1153_v63 = vsel %vm865_vm8, %v1137_v55, %v1152_v53  ;;  %v944_v0 = vperm.slane %v936_v60, %v3551_v17 }
 0x27e   : > { %v1161_v2 = vperm.slane %v1153_v63, %v3557_v26  ;;  %v945_v3 = vrot.slane %v940_v56, 4  ;;  %v948_v5 = vsel %vm865_vm8, %v940_v56, %v947_v58 }
 0x27f   : > { %v1138_v6 = vrot.slane %v1133_v61, 4  ;;  %v1141_v7 = vsel %vm865_vm8, %v1133_v61, %v1140_v57  ;;  %v1151_v45 = vsel %vm865_vm8, %v1150_v62, %v1125_v38  ;;  %v956_v9 = vperm.slane %v948_v5, %v3557_v26 }
 0x280   : > { %v1149_v11 = vperm.slane %v1141_v7, %v3557_v26  ;;  %v1157_v12 = vperm.slane %v1151_v45, %v3557_v26  ;;  %v1168_v13 = vrot.slane %v1161_v2, 4  ;;  %v946_v14 = vsel %vm865_vm8, %v945_v3, %v928_v46 }
 0x281   : > { %v1139_v15 = vsel %vm865_vm8, %v1138_v6, %v1121_v8  ;;  %v952_v16 = vperm.slane %v946_v14, %v3557_v26  ;;  %v957_v18 = vrot.slane %v944_v0, 4  ;;  %v960_v19 = vsel %vm865_vm8, %v944_v0, %v959_v1  ;;  %v1111_v45 = vpop.permute.xlu2 %1110 }
 0x282   : > { %v1145_v20 = vperm.slane %v1139_v15, %v3557_v26  ;;  %v1164_v21 = vrot.slane %v1149_v11, 4  ;;  %v1166_v22 = vrot.slane %v1157_v12, 4  ;;  %v1169_v23 = vsel %vm865_vm8, 0.0, %v1168_v13 }
 0x283   : > { %v1237_v24 = vsel %vm865_vm8, %v1168_v13, %v1157_v12  ;;  %v1242_v25 = vrot.slane %v1169_v23, 4  ;;  %v958_v27 = vsel %vm865_vm8, %v957_v18, %v932_v47  ;;  %v968_v28 = vperm.slane %v960_v19, %v3557_v26 }
 0x284   : > { %v1162_v29 = vrot.slane %v1145_v20, 4  ;;  %v1165_v30 = vsel %vm865_vm8, 0.0, %v1164_v21  ;;  %v1167_v31 = vsel %vm865_vm8, 0.0, %v1166_v22  ;;  %v1226_v32 = vsel %vm865_vm8, %v1164_v21, %v1145_v20 }
 0x285   : > { %v1230_v34 = vperm.slane %v1226_v32, %v3551_v17  ;;  %v1231_v35 = vrot.slane %v1165_v30, 4  ;;  %v1241_v36 = vperm.slane %v1237_v24, %v3551_v17  ;;  %v1243_v4 = vsel %vm865_vm8, %v1242_v25, %v1167_v31 }
 0x286   : > { %v1163_v37 = vsel %vm865_vm8, 0.0, %v1162_v29  ;;  %v1247_v38 = vperm.slane %v1243_v4, %v3551_v17  ;;  %v964_v8 = vperm.slane %v958_v27, %v3557_v26  ;;  %v969_v39 = vrot.slane %v952_v16, 4 }
 0x287   : > { %v1232_v41 = vsel %vm865_vm8, %v1231_v35, %v1163_v37  ;;  %v1250_v42 = vrot.slane %v1230_v34, 4  ;;  %v1262_v43 = vrot.slane %v1241_v36, 4  ;;  %v971_v46 = vrot.slane %v956_v9, 4 }
 0x288   : > { %v1236_v47 = vperm.slane %v1232_v41, %v3551_v17  ;;  %v1260_v48 = vrot.slane %v1247_v38, 4  ;;  %v970_v49 = vsel %vm865_vm8, 0.0, %v969_v39  ;;  %v973_v50 = vrot.slane %v964_v8, 4 }
 0x289   : > { %v1263_v51 = vsel %vm865_vm8, %v1247_v38, %v1262_v43  ;;  %v972_v10 = vsel %vm865_vm8, 0.0, %v971_v46  ;;  %v975_v52 = vrot.slane %v968_v28, 4  ;;  %v1031_v53 = vsel %vm865_vm8, %v971_v46, %v952_v16 }
 0x28a   : > { %v1248_v55 = vrot.slane %v1236_v47, 4  ;;  %v1251_v56 = vsel %vm865_vm8, %v1236_v47, %v1250_v42  ;;  %v1261_v57 = vsel %vm865_vm8, %v1260_v48, %v1241_v36  ;;  %v1271_v58 = vperm.slane %v1263_v51, %v3557_v26 }
 0x28b   : > { %v1259_v59 = vperm.slane %v1251_v56, %v3557_v26  ;;  %v1267_v60 = vperm.slane %v1261_v57, %v3557_v26  ;;  %v974_v61 = vsel %vm865_vm8, 0.0, %v973_v50  ;;  %v976_v62 = vsel %vm865_vm8, 0.0, %v975_v52 }
 0x28c   : > { %v1249_v63 = vsel %vm865_vm8, %v1248_v55, %v1230_v34  ;;  %v1276_v0 = vrot.slane %v1271_v58, 4  ;;  %v1035_v1 = vperm.slane %v1031_v53, %v3551_v17  ;;  %v1036_v2 = vrot.slane %v972_v10, 4 }
 0x28d   : > { %v1255_v3 = vperm.slane %v1249_v63, %v3557_v26  ;;  %v1272_v5 = vrot.slane %v1267_v60, 4  ;;  %v1278_v6 = vrot.slane %v1259_v59, 4  ;;  %v1042_v7 = vsel %vm865_vm8, %v975_v52, %v964_v8 }
 0x28e   : > { %v1277_v9 = vsel %vm865_vm8, %v1276_v0, %v1259_v59  ;;  %v1037_v11 = vsel %vm865_vm8, %v1036_v2, %v970_v49  ;;  %v1046_v12 = vperm.slane %v1042_v7, %v3551_v17  ;;  %v1047_v13 = vrot.slane %v976_v62, 4 }
 0x28f   : > { %v1273_v14 = vsel %vm865_vm8, %v1272_v5, %v1255_v3  ;;  %v1274_v15 = vrot.slane %v1255_v3, 4  ;;  %v1279_v16 = vsel %vm865_vm8, %v1271_v58, %v1278_v6  ;;  %1338 = vst.msk [vmem:[#allocation3 + $0x20] sm:$0xff] %vm1085_vm9, %v1277_v9  ;;  %v1041_v18 = vperm.slane %v1037_v11, %v3551_v17 }
 0x290   : > { %1334 = vst.msk [vmem:[#allocation3] sm:$0xff] %vm1085_vm9, %v1273_v14  ;;  %v1048_v19 = vsel %vm865_vm8, %v1047_v13, %v974_v61  ;;  %v1055_v20 = vrot.slane %v1035_v1, 4  ;;  %v1067_v21 = vrot.slane %v1046_v12, 4  ;;  %v1182_v22 = vrot.slane %v1111_v45, 4 }
 0x291   : > { %v1275_v23 = vsel %vm865_vm8, %v1267_v60, %v1274_v15  ;;  %1340 = vst.msk [vmem:[#allocation3 + $0x30] sm:$0xff] %vm1085_vm9, %v1279_v16  ;;  %v1052_v24 = vperm.slane %v1048_v19, %v3551_v17  ;;  %v1053_v25 = vrot.slane %v1041_v18, 4  ;;  %v1185_v27 = vsel %vm865_vm8, %v1111_v45, %v1184_v54 }
 0x292   : > { %v1208_v28 = vrot.slane %v3604_v33, 4  ;;  %1336 = vst.msk [vmem:[#allocation3 + $0x10] sm:$0xff] %vm1085_vm9, %v1275_v23  ;;  %v1056_v29 = vsel %vm865_vm8, %v1041_v18, %v1055_v20  ;;  %v1183_v30 = vsel %vm865_vm8, %v1182_v22, %v3614_v40  ;;  %v1193_v31 = vperm.slane %v1185_v27, %v3551_v17 }
 0x293   : > { %v1054_v32 = vsel %vm865_vm8, %v1053_v25, %v1035_v1  ;;  %v1064_v34 = vperm.slane %v1056_v29, %v3557_v26  ;;  %v1065_v35 = vrot.slane %v1052_v24, 4  ;;  %v1068_v36 = vsel %vm865_vm8, %v1052_v24, %v1067_v21 }
 0x294   : > { %v1060_v54 = vperm.slane %v1054_v32, %v3557_v26  ;;  %v1076_v4 = vperm.slane %v1068_v36, %v3557_v26  ;;  %v1189_v37 = vperm.slane %v1183_v30, %v3551_v17  ;;  %v1206_v38 = vrot.slane %v1193_v31, 4 }
 0x295   : > { %v1196_v8 = vrot.slane %v3621_v44, 4  ;;  %v1066_v40 = vsel %vm865_vm8, %v1065_v35, %v1046_v12  ;;  %v1083_v39 = vrot.slane %v1064_v34, 4  ;;  %v1209_v41 = vsel %vm865_vm8, %v1193_v31, %v1208_v28 }
 0x296   : > { %v1072_v42 = vperm.slane %v1066_v40, %v3557_v26  ;;  %v1079_v43 = vrot.slane %v1060_v54, 4  ;;  %v1081_v46 = vrot.slane %v1076_v4, 4  ;;  %v1194_v47 = vrot.slane %v1189_v37, 4 }
 0x297   : > { %v1084_v48 = vsel %vm865_vm8, %v1076_v4, %v1083_v39  ;;  %v1197_v49 = vsel %vm865_vm8, %v1189_v37, %v1196_v8  ;;  %v1207_v50 = vsel %vm865_vm8, %v1206_v38, %v3604_v33  ;;  %v1217_v51 = vperm.slane %v1209_v41, %v3557_v26 }
 0x298   : > { %v1077_v10 = vrot.slane %v1072_v42, 4  ;;  %v1080_v52 = vsel %vm865_vm8, %v1072_v42, %v1079_v43  ;;  %v1082_v53 = vsel %vm865_vm8, %v1081_v46, %v1064_v34  ;;  %1093 = vst.msk [vmem:[#allocation2 + $0x38] sm:$0xff] %vm1085_vm9, %v1084_v48  ;;  %v1195_v55 = vsel %vm865_vm8, %v1194_v47, %v3621_v44 }
 0x299   : > { %1089 = vst.msk [vmem:[#allocation2 + $0x18] sm:$0xff] %vm1085_vm9, %v1080_v52  ;;  %v1201_v56 = vperm.slane %v1195_v55, %v3557_v26  ;;  %v1205_v57 = vperm.slane %v1197_v49, %v3557_v26  ;;  %v1213_v33 = vperm.slane %v1207_v50, %v3557_v26  ;;  %v1224_v58 = vrot.slane %v1217_v51, 4 }
 0x29a   : > { %v1078_v59 = vsel %vm865_vm8, %v1077_v10, %v1060_v54  ;;  %1091 = vst.msk [vmem:[#allocation2 + $0x28] sm:$0xff] %vm1085_vm9, %v1082_v53 }
 0x29b   : > { %1087 = vst.msk [vmem:[#allocation2 + $0x8] sm:$0xff] %vm1085_vm9, %v1078_v59  ;;  %v1218_v60 = vrot.slane %v1201_v56, 4  ;;  %v1220_v61 = vrot.slane %v1205_v57, 4  ;;  %v1222_v62 = vrot.slane %v1213_v33, 4  ;;  %v1225_v44 = vsel %vm865_vm8, 0.0, %v1224_v58 }
 0x29c   : > { %v1291_v63 = vsel %vm865_vm8, %v1224_v58, %v1213_v33  ;;  %v1296_v0 = vrot.slane %v1225_v44, 4 }
 0x29d   : > { %v1219_v1 = vsel %vm865_vm8, 0.0, %v1218_v60  ;;  %v1221_v2 = vsel %vm865_vm8, 0.0, %v1220_v61  ;;  %v1223_v3 = vsel %vm865_vm8, 0.0, %v1222_v62  ;;  %v1280_v5 = vsel %vm865_vm8, %v1220_v61, %v1201_v56 }
 0x29e   : > { %v1284_v6 = vperm.slane %v1280_v5, %v3551_v17  ;;  %v1285_v7 = vrot.slane %v1221_v2, 4  ;;  %v1295_v45 = vperm.slane %v1291_v63, %v3551_v17  ;;  %v1297_v9 = vsel %vm865_vm8, %v1296_v0, %v1223_v3 }
 0x29f   : > { %v1301_v11 = vperm.slane %v1297_v9, %v3551_v17 }
 0x2a0   : > { %v1286_v12 = vsel %vm865_vm8, %v1285_v7, %v1219_v1  ;;  %v1304_v13 = vrot.slane %v1284_v6, 4  ;;  %v1316_v14 = vrot.slane %v1295_v45, 4 }
 0x2a1   : > { %v1290_v15 = vperm.slane %v1286_v12, %v3551_v17  ;;  %v1314_v16 = vrot.slane %v1301_v11, 4 }
 0x2a2   : > { %v1317_v18 = vsel %vm865_vm8, %v1301_v11, %v1316_v14 }
 0x2a3   : > { %v1302_v19 = vrot.slane %v1290_v15, 4  ;;  %v1305_v20 = vsel %vm865_vm8, %v1290_v15, %v1304_v13  ;;  %v1315_v21 = vsel %vm865_vm8, %v1314_v16, %v1295_v45  ;;  %v1325_v22 = vperm.slane %v1317_v18, %v3557_v26 }
 0x2a4   : > { %v1313_v23 = vperm.slane %v1305_v20, %v3557_v26  ;;  %v1321_v24 = vperm.slane %v1315_v21, %v3557_v26 }
 0x2a5   : > { %v1303_v25 = vsel %vm865_vm8, %v1302_v19, %v1284_v6  ;;  %v1330_v27 = vrot.slane %v1325_v22, 4 }
 0x2a6   : > { %v1309_v28 = vperm.slane %v1303_v25, %v3557_v26  ;;  %v1326_v17 = vrot.slane %v1321_v24, 4  ;;  %v1332_v29 = vrot.slane %v1313_v23, 4 }
 0x2a7   : > { %v1331_v30 = vsel %vm865_vm8, %v1330_v27, %v1313_v23 }
 0x2a8   : > { %v1327_v31 = vsel %vm865_vm8, %v1326_v17, %v1309_v28  ;;  %v1328_v32 = vrot.slane %v1309_v28, 4  ;;  %v1333_v34 = vsel %vm865_vm8, %v1325_v22, %v1332_v29  ;;  %1339 = vst.msk [vmem:[#allocation3 + $0x28] sm:$0xff] %vm1085_vm9, %v1331_v30 }
 0x2a9   : > { %1335 = vst.msk [vmem:[#allocation3 + $0x8] sm:$0xff] %vm1085_vm9, %v1327_v31 }
 0x2aa   : > { %v1329_v35 = vsel %vm865_vm8, %v1321_v24, %v1328_v32  ;;  %1341 = vst.msk [vmem:[#allocation3 + $0x38] sm:$0xff] %vm1085_vm9, %v1333_v34 }
 0x2ab   : > { %1337 = vst.msk [vmem:[#allocation3 + $0x18] sm:$0xff] %vm1085_vm9, %v1329_v35 }
 0x2ac PF: > { %s2399_s20 = sshll.u32 %s3068_s1, 3  ;;  %vm1347_vm10 = vcmask 523264   ;;  %v3151_v54 = vmov 64.0   ;;  %s4347_s27 = sld [smem:[#allocation33_spill]]  ;;  %v2709_v63 = vld [vmem:[#allocation9] ss:$0 sm:$0xff] }
 0x2ad   : > { %s1343_s16 = scalar_lea.vmem %s3425_s24, %s2399_s20 [#allocation4]  ;;  %2712 = vrcp.f32 %v3151_v54  ;;  %s4349_s30 = sld [smem:[#allocation32_spill]]  ;;  %v3155_v9 = vmov 1983009808   ;;  %vm1431_vm15 = vcmask 1047556   ;;  %v3156_v20 = vmov 1934713408  }
 0x2ae   : > { %v3757_v26 = vld [vmem:[%s1343_s16] sm:$0xff]  ;;  %s4350_s25 = sld [smem:[#allocation34_spill]]  ;;  %s3152_s17 = smov 80   ;;  %v1436_v11 = vunpack.c.l.s4 %v3155_v9  ;;  %v1460_v21 = vunpack.c.l.s4 %v3156_v20 }
 0x2af   : > { %v1348_v36 = vsel %vm1347_vm10, %v3757_v26, 0.0  ;;  %s3153_s10 = smov 96   ;;  %s3154_s11 = smov 112  }
 0x2b0   : > { %1349 = vadd.xlane.f32.xlu0 %v1348_v36  ;;  %v3799_v18 = vunpack.c.0.s8 %v1436_v11  ;;  %v3804_v27 = vunpack.c.0.s8 %v1460_v21  ;;  %v3850_v21 = vmov 0.0   ;;  %s3874_s23 = smov 0  }
 0x2b2   : > { %s4348_s3 = smov %s4347_s27  ;;  %v1392_v48 = vld [vmem:[%s4347_s27 + $0x38] sm:$0xff] }
 0x2b3   : > { %v2713_v4 = vpop.eup %2712  ;;  %1408 = vmatpush.msra.mxu0 %v1392_v48  ;;  %v1391_v49 = vld [vmem:[%s4348_s3 + $0x30] sm:$0xff]  ;;  %v1390_v50 = vld [vmem:[%s4348_s3 + $0x28] sm:$0xff]  ;;  %v1389_v51 = vld [vmem:[%s4348_s3 + $0x20] sm:$0xff] }
 0x2b4   : > { %v1352_v37 = vmul.f32 64.0, %v2713_v4  ;;  %vm1356_vm11 = vweird.f32 %v2713_v4  ;;  %v1388_v10 = vld [vmem:[%s4348_s3 + $0x18] sm:$0xff]  ;;  %v1387_v52 = vld [vmem:[%s4348_s3 + $0x10] sm:$0xff]  ;;  %v1386_v53 = vld [vmem:[%s4348_s3 + $0x8] sm:$0xff] }
 0x2b5   : > { %1409 = vmatpush.msra.mxu0 %v1391_v49  ;;  %v1385_v55 = vld [vmem:[%s4348_s3] sm:$0xff] }
 0x2b6   : > { %v1353_v38 = vsub.f32 1.0, %v1352_v37  ;;  %v2710_v2 = vld [vmem:[%s4349_s30] ss:$0 sm:$0xff] }
 0x2b7   : > { %1410 = vmatpush.msra.mxu0 %v1390_v50  ;;  %v2711_v6 = vld [vmem:[%s4350_s25] ss:$0 sm:$0xff] }
 0x2b8   : > { %v1354_v8 = vmul.f32 %v2713_v4, %v1353_v38 }
 0x2b9   : > { %1411 = vmatpush.msra.mxu0 %v1389_v51 }
 0x2ba   : > { %v1355_v40 = vadd.f32 %v2713_v4, %v1354_v8 }
 0x2bb   : > { %1412 = vmatpush.msra.mxu0 %v1388_v10 }
 0x2bc   : > { %v3761_v39 = vsel %vm1356_vm11, %v2713_v4, %v1355_v40 }
 0x2bd   : > { %1413 = vmatpush.msra.mxu0 %v1387_v52 }
 0x2bf   : > { %1414 = vmatpush.msra.mxu0 %v1386_v53 }
 0x2c1   : > { %1415 = vmatpush.msra.mxu0 %v1385_v55 }
 0x323   : > { %v1350_v41 = vpop.xlane.xlu0 %1349 }
 0x324   : > { %v1358_v42 = vmul.f32 %v3761_v39, %v1350_v41 }
 0x326   : > { %v1359_v43 = vsub.f32 %v3757_v26, %v1358_v42 }
 0x328   : > { %v1360_v46 = vmul.f32 %v1359_v43, %v1359_v43 }
 0x32a   : > { %v1361_v47 = vsel %vm1347_vm10, %v1360_v46, 0.0 }
 0x32b   : > { %1362 = vadd.xlane.f32.xlu0 %v1361_v47 }
 0x39e   : > { %v1363_v56 = vpop.xlane.xlu0 %1362 }
 0x39f   : > { %v1364_v57 = vmul.f32 %v1363_v56, %v3761_v39 }
 0x3a1   : > { %v1365_v33 = vadd.f32 1e-06, %v1364_v57 }
 0x3a3   : > { %2714 = vrsqrt.f32 %v1365_v33  ;;  %vm1372_vm13 = vweird.f32 %v1365_v33 }
 0x3a9   : > { %v2715_v58 = vpop.eup %2714 }
 0x3aa   : > { %v1367_v59 = vmul.f32 %v2715_v58, %v1365_v33  ;;  %vm1373_vm12 = vweird.f32 %v2715_v58 }
 0x3ab   : > { %vm1374_vm14 = vmor %vm1372_vm13, %vm1373_vm12 }
 0x3ac   : > { %v1368_v60 = vmul.f32 %v2715_v58, %v1367_v59 }
 0x3ae   : > { %v1369_v61 = vmul.f32 0.5, %v1368_v60 }
 0x3b0   : > { %v1370_v62 = vsub.f32 1.5, %v1369_v61 }
 0x3b2   : > { %v1371_v44 = vmul.f32 %v2715_v58, %v1370_v62 }
 0x3b4   : > { %v1375_v0 = vsel %vm1374_vm14, %v2715_v58, %v1371_v44 }
 0x3b5   : > { %v1376_v1 = vmul.f32 %v1375_v0, %v1359_v43 }
 0x3b7   : > { %v1380_v3 = vmul.f32 %v2709_v63, %v1376_v1 }
 0x3b9   : > { %v1384_v5 = vadd.f32 %v2710_v2, %v1380_v3 }
 0x3bb   : > { %2400 = vmatmul.msk.f32.vlgmr.msra.gmra.mxu0 %vm1347_vm10, %v1384_v5 }
 0x438   : > { %v1417_v7 = vpop.f32.mrf.mxu0 }
 0x439   : > { %v1418_v45 = vadd.f32 %v2711_v6, %v1417_v7 }
 0x43b   : > { %1427 = vrot.lane.b32.xlu2 %v1418_v45, %s3152_s17  ;;  %1424 = vrot.lane.b32.xlu1 %v1418_v45, %s3153_s10  ;;  %v1433_v15 = vrot.slane %v1418_v45, 4 }
 0x443   : > { %1421 = vrot.lane.b32.xlu1 %v1418_v45, %s3154_s11 }
 0x495   : > { %v1428_v16 = vpop.permute.xlu2 %1427 }
 0x496   : > { %v1443_v23 = vrot.slane %v1428_v16, 4 }
 0x4ad   : > { %v1425_v12 = vpop.permute.xlu1 %1424 }
 0x4ae   : > { %v1430_v13 = vrot.slane %v1425_v12, 4  ;;  %v1434_v19 = vsel %vm1431_vm15, %v1425_v12, %v1433_v15 }
 0x4af   : > { %v1442_v24 = vperm.slane %v1434_v19, %v3799_v18 }
 0x4b0   : > { %v1432_v14 = vsel %vm1431_vm15, %v1430_v13, %v1418_v45 }
 0x4b1   : > { %v1438_v22 = vperm.slane %v1432_v14, %v3799_v18  ;;  %v1469_v32 = vrot.slane %v1442_v24, 4 }
 0x4b3   : > { %v1457_v29 = vrot.slane %v1438_v22, 4 }
 0x4b5   : > { %v1422_v25 = vpop.permute.xlu1 %1421 }
 0x4b6   : > { %v1444_v28 = vsel %vm1431_vm15, %v1443_v23, %v1422_v25  ;;  %v1445_v17 = vrot.slane %v1422_v25, 4  ;;  %v3854_v23 = vmov 0.0   ;;  %v3858_v25 = vmov 0.0  }
 0x4b7   : > { %v1450_v30 = vperm.slane %v1444_v28, %v3799_v18  ;;  %v3860_v28 = vmov 0.0  }
 0x4b8   : > { %v1446_v31 = vsel %vm1431_vm15, %v1428_v16, %v1445_v17  ;;  %v3862_v17 = vmov 0.0  }
 0x4b9   : > { %v1454_v34 = vperm.slane %v1446_v31, %v3799_v18  ;;  %v1455_v35 = vrot.slane %v1450_v30, 4  ;;  %v1458_v36 = vsel %vm1431_vm15, %v1450_v30, %v1457_v29  ;;  %v3864_v29 = vmov 0.0  }
 0x4ba   : > { %v1466_v54 = vperm.slane %v1458_v36, %v3804_v27  ;;  %v3866_v30 = vmov -1e+30   ;;  %v3868_v31 = vmov -1e+30  }
 0x4bb   : > { %v1456_v4 = vsel %vm1431_vm15, %v1455_v35, %v1438_v22  ;;  %v1467_v37 = vrot.slane %v1454_v34, 4  ;;  %v1470_v38 = vsel %vm1431_vm15, %v1454_v34, %v1469_v32  ;;  %v3852_v22 = vmov 0.0  }
 0x4bc   : > { %v1462_v8 = vperm.slane %v1456_v4, %v3804_v27  ;;  %v1478_v40 = vperm.slane %v1470_v38, %v3804_v27  ;;  %v1481_v41 = vrot.slane %v1466_v54, 4  ;;  %v3870_v32 = vmov -1e+30  }
 0x4bd   : > { %v1468_v42 = vsel %vm1431_vm15, %v1467_v37, %v1442_v24  ;;  %v3856_v24 = vmov 0.0   ;;  %v3872_v34 = vmov -1e+30  }
 0x4be   : > { %v1474_v43 = vperm.slane %v1468_v42, %v3804_v27  ;;  %v1479_v46 = vrot.slane %v1462_v8, 4  ;;  %v1482_v47 = vsel %vm1431_vm15, 0.0, %v1481_v41  ;;  %v1485_v48 = vrot.slane %v1478_v40, 4 }
 0x4bf   : > { %v1487_v49 = vsel %vm1431_vm15, %v1481_v41, %v1462_v8  ;;  %v1492_v50 = vrot.slane %v1482_v47, 4 }
 0x4c0   : > { %v1480_v51 = vsel %vm1431_vm15, 0.0, %v1479_v46  ;;  %v1483_v10 = vrot.slane %v1474_v43, 4  ;;  %v1486_v52 = vsel %vm1431_vm15, 0.0, %v1485_v48  ;;  %v1491_v53 = vperm.slane %v1487_v49, %v3799_v18 }
 0x4c1   : > { %v1493_v55 = vsel %vm1431_vm15, %v1492_v50, %v1480_v51  ;;  %v1498_v56 = vsel %vm1431_vm15, %v1485_v48, %v1474_v43  ;;  %v1503_v57 = vrot.slane %v1486_v52, 4 }
 0x4c2   : > { %v1484_v33 = vsel %vm1431_vm15, 0.0, %v1483_v10  ;;  %v1497_v58 = vperm.slane %v1493_v55, %v3799_v18  ;;  %v1502_v59 = vperm.slane %v1498_v56, %v3799_v18  ;;  %v1511_v60 = vrot.slane %v1491_v53, 4 }
 0x4c3   : > { %v1504_v61 = vsel %vm1431_vm15, %v1503_v57, %v1484_v33 }
 0x4c4   : > { %v1508_v62 = vperm.slane %v1504_v61, %v3799_v18  ;;  %v1509_v44 = vrot.slane %v1497_v58, 4  ;;  %v1512_v63 = vsel %vm1431_vm15, %v1497_v58, %v1511_v60  ;;  %v1523_v0 = vrot.slane %v1502_v59, 4 }
 0x4c5   : > { %v1520_v1 = vperm.slane %v1512_v63, %v3804_v27 }
 0x4c6   : > { %v1510_v2 = vsel %vm1431_vm15, %v1509_v44, %v1491_v53  ;;  %v1521_v3 = vrot.slane %v1508_v62, 4  ;;  %v1524_v5 = vsel %vm1431_vm15, %v1508_v62, %v1523_v0 }
 0x4c7   : > { %v1516_v6 = vperm.slane %v1510_v2, %v3804_v27  ;;  %v1532_v7 = vperm.slane %v1524_v5, %v3804_v27  ;;  %v1539_v45 = vrot.slane %v1520_v1, 4 }
 0x4c8   : > { %v1522_v9 = vsel %vm1431_vm15, %v1521_v3, %v1502_v59 }
 0x4c9   : > { %v1528_v11 = vperm.slane %v1522_v9, %v3804_v27  ;;  %v1535_v12 = vrot.slane %v1516_v6, 4  ;;  %v1537_v13 = vrot.slane %v1532_v7, 4  ;;  %v3839_v14 = vsel %vm1431_vm15, %v1532_v7, %v1539_v45 }
 0x4cb   : > { %v1533_v15 = vrot.slane %v1528_v11, 4  ;;  %v3842_v16 = vsel %vm1431_vm15, %v1528_v11, %v1535_v12  ;;  %v3845_v19 = vsel %vm1431_vm15, %v1537_v13, %v1520_v1 }
 0x4cd   : > { %v3848_v20 = vsel %vm1431_vm15, %v1533_v15, %v1516_v6 }
 0x4ce LB: >> { %s2401_s12 = sshll.u32 %s3136_s23, 3  ;;  %s1570_s18 = scalar_lea.vmem %s3432_s14, %s3136_s23 [#allocation7]  ;;  %vm1575_vm0 = vcmask 130048   ;;  %vm1680_vm1 = vcmask 64512   ;;  %s3136_s23 = sphi %s3874_s23, %s1546_s23   ;;  %v3132_v34 = vphi %v3872_v34, %v4371_v34   ;;  %v3128_v32 = vphi %v3870_v32, %v4370_v32   ;;  %v3124_v31 = vphi %v3868_v31, %v4369_v31   ;;  %v3120_v30 = vphi %v3866_v30, %v4368_v30   ;;  %v3116_v29 = vphi %v3864_v29, %v4367_v29   ;;  %v3112_v17 = vphi %v3862_v17, %v4366_v17   ;;  %v3108_v28 = vphi %v3860_v28, %v4365_v28   ;;  %v3104_v25 = vphi %v3858_v25, %v4364_v25   ;;  %v3100_v24 = vphi %v3856_v24, %v4363_v24   ;;  %v3096_v23 = vphi %v3854_v23, %v4362_v23   ;;  %v3092_v22 = vphi %v3852_v22, %v4361_v22   ;;  %v3088_v21 = vphi %v3850_v21, %v4360_v21  }
 0x4cf   : >> { %s1560_s15 = scalar_lea.vmem [#allocation2], %s2401_s12  ;;  %v2716_v37 = vld [vmem:[%s1570_s18] ss:$0 sm:$0xff]  ;;  %s1565_s21 = scalar_lea.vmem [#allocation3], %s2401_s12 }
 0x4d0   : >> { %v1561_v35 = vld [vmem:[%s1560_s15] sm:$0xff]  ;;  %v1562_v54 = vld [vmem:[%s1560_s15 + $0x10] sm:$0xff]  ;;  %s1546_s23 = sadd.s32 1, %s3136_s23  }
 0x4d1   : >> { %v1563_v36 = vld [vmem:[%s1560_s15 + $0x20] sm:$0xff]  ;;  %2402 = vmatpush.xpose.msk.msra.mxu0 %vm1575_vm0, %v1561_v35  ;;  %v1564_v4 = vld [vmem:[%s1560_s15 + $0x30] sm:$0xff]  ;;  %2404 = vmatpush.xpose.msk.msra.mxu1 %vm1575_vm0, %v1562_v54  ;;  %p3995_p1 = scmp.ge.s32.totalorder %s1546_s23, 2  }
 0x4d2   : >> { %2406 = vmatpush.xpose.msk.msra.mxu2 %vm1575_vm0, %v1563_v36  ;;  %2408 = vmatpush.xpose.msk.msra.mxu3 %vm1575_vm0, %v1564_v4  ;;  %v1566_v10 = vld [vmem:[%s1565_s21] sm:$0xff]  ;;  %v1567_v53 = vld [vmem:[%s1565_s21 + $0x10] sm:$0xff]  ;;  %s3157_s14 = smov (%p3995_p1), 48   ;;  %s3158_s4 = smov (%p3995_p1), 16  }
 0x4d3   : >> { %v1568_v52 = vld [vmem:[%s1565_s21 + $0x20] sm:$0xff]  ;;  %v1569_v55 = vld [vmem:[%s1565_s21 + $0x30] sm:$0xff]  ;;  %s3159_s7 = smov (%p3995_p1), 32   ;;  %s4380_s24 = sld [smem:[#allocation38_spill]] (%p3995_p1) }
 0x4d4   : >> { %2403 = vmatmul.msk.f32.vlgmr.msra.gmra.mxu0 %vm1575_vm0, %v3848_v20  ;;  %2405 = vmatmul.msk.f32.vlgmr.msra.gmra.mxu1 %vm1575_vm0, %v3842_v16  ;;  %s4381_s9 = sld [smem:[#allocation43_spill]] (%p3995_p1)  ;;  %s2190_s30 = sshll.u32 (%p3995_p1), %s697_s26, 4  ;;  %s2191_s30 = int_to_ptr.vmem [resolvable:$true] %s2190_s30 }
 0x4d5   : >> { %2407 = vmatmul.msk.f32.vlgmr.msra.gmra.mxu2 %vm1575_vm0, %v3845_v19  ;;  %2409 = vmatmul.msk.f32.vlgmr.msra.gmra.mxu3 %vm1575_vm0, %v3839_v14  ;;  %s4382_s21 = sld [smem:[#allocation39_spill]] (%p3995_p1) }
 0x4d6   : >> { %1759 = vmatpush.msrb.mxu0 %v1566_v10  ;;  %1805 = vmatpush.msrb.mxu2 %v1568_v52  ;;  %s4385_s11 = sld [smem:[#allocation42_spill]] (%p3995_p1) }
 0x4d7   : >> { %1782 = vmatpush.msrb.mxu1 %v1567_v53  ;;  %1828 = vmatpush.msrb.mxu3 %v1569_v55  ;;  %s4386_s5 = sld [smem:[#allocation44_spill]] (%p3995_p1) }
 0x4d8   : > { %s4388_s16 = sld [smem:[#allocation45_spill]] (%p3995_p1) }
 0x551   : >> { %v1599_v38 = vpop.f32.mrf.mxu0  ;;  %v1625_v40 = vpop.f32.mrf.mxu1 }
 0x552   : >> { %v1600_v8 = vadd.f32 %v2716_v37, %v1599_v38  ;;  %v1626_v42 = vadd.f32 %v2716_v37, %v1625_v40 }
 0x554   : >> { %v1681_v41 = vsel %vm1680_vm1, %v1600_v8, -inf  ;;  %v1684_v49 = vsel %vm1680_vm1, %v1626_v42, -inf }
 0x555   : >> { %1682 = vmax.xlane.f32.xlu1 %v1681_v41 }
 0x558   : >> { %v1651_v43 = vpop.f32.mrf.mxu2  ;;  %v1677_v47 = vpop.f32.mrf.mxu3 }
 0x559   : >> { %v1652_v46 = vadd.f32 %v2716_v37, %v1651_v43  ;;  %v1678_v50 = vadd.f32 %v2716_v37, %v1677_v47 }
 0x55b   : >> { %v1687_v48 = vsel %vm1680_vm1, %v1652_v46, -inf  ;;  %v1690_v51 = vsel %vm1680_vm1, %v1678_v50, -inf }
 0x55c   : >> { %1688 = vmax.xlane.f32.xlu0 %v1687_v48 }
 0x55d   : >> { %1685 = vmax.xlane.f32.xlu1 %v1684_v49 }
 0x564   : >> { %1691 = vmax.xlane.f32.xlu0 %v1690_v51 }
 0x5c8   : >> { %v1683_v56 = vpop.xlane.xlu1 %1682 }
 0x5c9   : >> { %v3939_v57 = vmax.f32 %v3132_v34, %v1683_v56  }
 0x5cb   : >> { %v1697_v33 = vsub.f32 %v3132_v34, %v3939_v57  ;;  %v1709_v58 = vsub.f32 %v1600_v8, %v3939_v57 }
 0x5cd   : >> { %v1713_v59 = vmul.f32 1.442695, %v1709_v58  ;;  %v1701_v36 = vmul.f32 1.442695, %v1697_v33 }
 0x5cf   : >> { %v1689_v60 = vpop.xlane.xlu0 %1688  ;;  %2717 = vpow2.f32 %v1713_v59 }
 0x5d0   : >> { %v3945_v61 = vmax.f32 %v3124_v31, %v1689_v60   ;;  %v1686_v62 = vpop.xlane.xlu1 %1685 }
 0x5d1   : >> { %v3951_v0 = vmax.f32 %v3128_v32, %v1686_v62  }
 0x5d2   : >> { %v1699_v44 = vsub.f32 %v3124_v31, %v3945_v61  ;;  %v1711_v63 = vsub.f32 %v1652_v46, %v3945_v61 }
 0x5d3   : >> { %v1698_v2 = vsub.f32 %v3128_v32, %v3951_v0  ;;  %v1710_v3 = vsub.f32 %v1626_v42, %v3951_v0 }
 0x5d4   : >> { %v1717_v1 = vmul.f32 1.442695, %v1711_v63  ;;  %v1705_v54 = vmul.f32 1.442695, %v1699_v44 }
 0x5d5   : >> { %v1715_v5 = vmul.f32 1.442695, %v1710_v3  ;;  %v2718_v6 = vpop.eup %2717  ;;  %v1703_v4 = vmul.f32 1.442695, %v1698_v2 }
 0x5d6   : >> { %2719 = vpow2.f32 %v1717_v1  ;;  %2410 = vmatmul.msk.f32.vlgmr.msrb.gmra.mxu0 %vm1680_vm1, %v2718_v6  ;;  %v1725_v9 = vsel %vm1680_vm1, %v2718_v6, 0.0 }
 0x5d7   : >> { %v1692_v7 = vpop.xlane.xlu0 %1691  ;;  %2721 = vpow2.f32 %v1715_v5  ;;  %1726 = vadd.xlane.f32.xlu2 %v1725_v9 }
 0x5d8   : >> { %v3957_v45 = vmax.f32 %v3120_v30, %v1692_v7  }
 0x5da   : >> { %v1700_v11 = vsub.f32 %v3120_v30, %v3957_v45  ;;  %v1712_v12 = vsub.f32 %v1678_v50, %v3957_v45 }
 0x5dc   : >> { %v1719_v13 = vmul.f32 1.442695, %v1712_v12  ;;  %v2720_v15 = vpop.eup %2719  ;;  %v1707_v8 = vmul.f32 1.442695, %v1700_v11 }
 0x5dd   : >> { %2412 = vmatmul.msk.f32.vlgmr.msrb.gmra.mxu2 %vm1680_vm1, %v2720_v15  ;;  %v1731_v31 = vsel %vm1680_vm1, %v2720_v15, 0.0  ;;  %v2722_v32 = vpop.eup %2721 }
 0x5de   : >> { %2723 = vpow2.f32 %v1719_v13  ;;  %1732 = vadd.xlane.f32.xlu0 %v1731_v31  ;;  %2411 = vmatmul.msk.f32.vlgmr.msrb.gmra.mxu1 %vm1680_vm1, %v2722_v32  ;;  %v1728_v34 = vsel %vm1680_vm1, %v2722_v32, 0.0  ;;  %v4369_v31 = vmov %v3945_v61  ;;  %v4370_v32 = vmov %v3951_v0 }
 0x5df   : >> { %1729 = vadd.xlane.f32.xlu2 %v1728_v34  ;;  %2725 = vpow2.f32 %v1701_v36  ;;  %v4371_v34 = vmov %v3939_v57 }
 0x5e0   : >> { %2727 = vpow2.f32 %v1705_v54 }
 0x5e1   : >> { %2729 = vpow2.f32 %v1703_v4 }
 0x5e2   : >> { %2731 = vpow2.f32 %v1707_v8 }
 0x5e4   : >> { %v2724_v35 = vpop.eup %2723 }
 0x5e5   : >> { %2413 = vmatmul.msk.f32.vlgmr.msrb.gmra.mxu3 %vm1680_vm1, %v2724_v35  ;;  %v1734_v30 = vsel %vm1680_vm1, %v2724_v35, 0.0  ;;  %v2726_v37 = vpop.eup %2725 }
 0x5e6   : >> { %1735 = vadd.xlane.f32.xlu1 %v1734_v30  ;;  %v1721_v38 = vmul.f32 %v3116_v29, %v2726_v37  ;;  %v2728_v42 = vpop.eup %2727  ;;  %v1833_v51 = vmul.f32 %v3100_v24, %v2726_v37  ;;  %v4368_v30 = vmov %v3957_v45 }
 0x5e7   : >> { %v2730_v43 = vpop.eup %2729  ;;  %v1723_v46 = vmul.f32 %v3108_v28, %v2728_v42 }
 0x5e8   : >> { %v1722_v49 = vmul.f32 %v3112_v17, %v2730_v43  ;;  %v2732_v53 = vpop.eup %2731  ;;  %v1834_v58 = vmul.f32 %v3096_v23, %v2730_v43 }
 0x64a   : >> { %v1727_v40 = vpop.xlane.xlu2 %1726 }
 0x64b   : >> { %v3971_v29 = vadd.f32 %v1727_v40, %v1721_v38  }
 0x64d   : >> { %v4351_v41 = vmov %v3971_v29  ;;  %v1724_v29 = vmul.f32 %v3104_v25, %v2732_v53 }
 0x64e   : > { %2738 = vrcp.f32 (%p3995_p1), %v4351_v41  ;;  %v1850_v2 = vand.u32 (%p3995_p1), 2147483647, %v4351_v41  ;;  %v1852_v61 = vand.u32 (%p3995_p1), 2147483648, %v4351_v41  ;;  %vm1846_vm2 = vweird.f32 (%p3995_p1), %v4351_v41 }
 0x650   : > { %vm4050_vm4 = vcmp.eq.f32.partialorder (%p3995_p1), %v1850_v2, 8.507059e+37  ;;  %v1853_v20 = vor.u32 (%p3995_p1), 1.1754944e-38, %v1852_v61 }
 0x651   : >> { %v1733_v47 = vpop.xlane.xlu0 %1732 }
 0x652   : >> { %v3974_v28 = vadd.f32 %v1733_v47, %v1723_v46   ;;  %v1730_v50 = vpop.xlane.xlu2 %1729 }
 0x653   : >> { %v3978_v17 = vadd.f32 %v1730_v50, %v1722_v49   ;;  %v1761_v52 = vpop.f32.mrf.mxu0 }
 0x654   : >> { %v4352_v48 = vmov %v3974_v28  ;;  %v3980_v24 = vadd.f32 %v1833_v51, %v1761_v52   ;;  %v1835_v28 = vmul.f32 %v3092_v22, %v2728_v42  ;;  %v2739_v3 = vpop.eup (%p3995_p1), %2738 }
 0x655   : >> { %v4353_v10 = vmov %v3978_v17  ;;  %v1836_v17 = vmul.f32 %v3088_v21, %v2732_v53  ;;  %v1842_v5 = vmul.f32 (%p3995_p1), %v2739_v3, %v4351_v41  ;;  %vm1874_vm5 = vweird.f32 (%p3995_p1), %v4352_v48 }
 0x656   : >> { %v4354_v55 = vmov %v3980_v24  ;;  %2740 = vrcp.f32 (%p3995_p1), %v4353_v10  ;;  %v1866_v0 = vand.u32 (%p3995_p1), 2147483648, %v4353_v10  ;;  %vm1860_vm3 = vweird.f32 (%p3995_p1), %v4353_v10 }
 0x657   : >> { %v4363_v24 = vmov %v4354_v55  ;;  %2742 = vrcp.f32 (%p3995_p1), %v4352_v48  ;;  %v1864_v14 = vand.u32 (%p3995_p1), 2147483647, %v4353_v10  ;;  %vm1847_vm6 = vweird.f32 (%p3995_p1), %v2739_v3 }
 0x658   : > { %v1878_v7 = vand.u32 (%p3995_p1), 2147483647, %v4352_v48  ;;  %v1880_v45 = vand.u32 (%p3995_p1), 2147483648, %v4352_v48  ;;  %vm4062_vm9 = vmor (%p3995_p1), %vm1846_vm2, %vm1847_vm6  ;;  %vm2027_vm6 = vcmask (%p3995_p1), 392192  }
 0x659   : >> { %v1736_v56 = vpop.xlane.xlu1 %1735  ;;  %vm1865_vm14 = vcmp.eq.f32.partialorder (%p3995_p1), %v1864_v14, 8.507059e+37 }
 0x65a   : >> { %v3983_v25 = vadd.f32 %v1736_v56, %v1724_v29   ;;  %v4367_v29 = vmov %v4351_v41  ;;  %v1881_v37 = vor.u32 (%p3995_p1), 1.1754944e-38, %v1880_v45  ;;  %vm1879_vm2 = vcmp.eq.f32.partialorder (%p3995_p1), %v1878_v7, 8.507059e+37 }
 0x65b   : >> { %v1784_v59 = vpop.f32.mrf.mxu1 }
 0x65c   : >> { %v4355_v33 = vmov %v3983_v25  ;;  %v3986_v23 = vadd.f32 %v1834_v58, %v1784_v59   ;;  %v2741_v57 = vpop.eup (%p3995_p1), %2740 }
 0x65d   : >> { %v4364_v25 = vmov %v4355_v33  ;;  %2744 = vrcp.f32 (%p3995_p1), %v4355_v33  ;;  %v2743_v16 = vpop.eup (%p3995_p1), %2742  ;;  %vm1861_vm7 = vweird.f32 (%p3995_p1), %v2741_v57  ;;  %vm1888_vm11 = vweird.f32 (%p3995_p1), %v4355_v33 }
 0x65e   : >> { %v4356_v60 = vmov %v3986_v23  ;;  %v1870_v24 = vmul.f32 (%p3995_p1), %v2743_v16, %v4352_v48  ;;  %vm1875_vm8 = vweird.f32 (%p3995_p1), %v2743_v16  ;;  %v1892_v31 = vand.u32 (%p3995_p1), 2147483647, %v4355_v33  ;;  %vm4071_vm12 = vmor (%p3995_p1), %vm1860_vm3, %vm1861_vm7 }
 0x65f   : >> { %v4362_v23 = vmov %v4356_v60  ;;  %v1894_v32 = vand.u32 (%p3995_p1), 2147483648, %v4355_v33  ;;  %vm4077_vm1 = vmor (%p3995_p1), %vm1874_vm5, %vm1875_vm8 }
 0x660   : >> { %v1807_v62 = vpop.f32.mrf.mxu2  ;;  %v1867_v23 = vor.u32 (%p3995_p1), 1.1754944e-38, %v1866_v0  ;;  %v1871_v11 = vsub.f32 (%p3995_p1), 1.0, %v1870_v24  ;;  %vm1893_vm5 = vcmp.eq.f32.partialorder (%p3995_p1), %v1892_v31, 8.507059e+37  ;;  %v2034_v0 = vld [vmem:[#allocation10 + $0x28] sm:$0xff] (%p3995_p1) }
 0x661   : >> { %v3989_v22 = vadd.f32 %v1835_v28, %v1807_v62   ;;  %v4365_v28 = vmov %v4352_v48  ;;  %v1895_v43 = vor.u32 (%p3995_p1), 1.1754944e-38, %v1894_v32 }
 0x662   : > { %v1872_v30 = vmul.f32 (%p3995_p1), %v2743_v16, %v1871_v11 }
 0x663   : >> { %v4357_v44 = vmov %v3989_v22  ;;  %v2745_v25 = vpop.eup (%p3995_p1), %2744 }
 0x664   : >> { %v4361_v22 = vmov %v4357_v44  ;;  %v1884_v12 = vmul.f32 (%p3995_p1), %v2745_v25, %v4355_v33  ;;  %vm1889_vm13 = vweird.f32 (%p3995_p1), %v2745_v25  ;;  %v1873_v8 = vadd.f32 (%p3995_p1), %v2743_v16, %v1872_v30 }
 0x665   : > { %v1843_v22 = vsub.f32 (%p3995_p1), 1.0, %v1842_v5  ;;  %vm1890_vm3 = vmor (%p3995_p1), %vm1888_vm11, %vm1889_vm13 }
 0x666   : > { %v1885_v36 = vsub.f32 (%p3995_p1), 1.0, %v1884_v12  ;;  %v1877_v47 = vsel (%p3995_p1), %vm4077_vm1, %v2743_v16, %v1873_v8 }
 0x667   : > { %v1844_v9 = vmul.f32 (%p3995_p1), %v2739_v3, %v1843_v22  ;;  %v1882_v50 = vsel (%p3995_p1), %vm1879_vm2, %v1881_v37, %v1877_v47 }
 0x668   : >> { %v1830_v63 = vpop.f32.mrf.mxu3  ;;  %1545 = sbr.rel (!%p3995_p1) target bundleno = 1230 (0x4ce), region = 177  ;;  %v1886_v40 = vmul.f32 (%p3995_p1), %v2745_v25, %v1885_v36  ;;  %v1899_v52 = vmul.f32 (%p3995_p1), %v1882_v50, %v4357_v44 }
 0x669   : >> { %v3992_v21 = vadd.f32 %v1836_v17, %v1830_v63   ;;  %v4366_v17 = vmov %v4353_v10  ;;  %v1845_v34 = vadd.f32 (%p3995_p1), %v2739_v3, %v1844_v9  ;;  %v2036_v63 = vld [vmem:[#allocation10 + $0x38] sm:$0xff] (%p3995_p1) }
 0x66a   : > { %v1887_v48 = vadd.f32 (%p3995_p1), %v2745_v25, %v1886_v40  ;;  %v1901_v58 = vrot.slane (%p3995_p1), %v1899_v52, 4  ;;  %2052 = vmatpush.msra.mxu0 (%p3995_p1), %v2036_v63 }
 0x66b   : >> { %v4358_v1 = vmov %v3992_v21  ;;  %v1849_v38 = vsel (%p3995_p1), %vm4062_vm9, %v2739_v3, %v1845_v34 }
 0x66c   : >> { %v4360_v21 = vmov %v4358_v1  ;;  %v1854_v41 = vsel (%p3995_p1), %vm4050_vm4, %v1853_v20, %v1849_v38  ;;  %vm2025_vm4 = vcmask (%p3995_p1), 261120  }
 0x66d   : > { %v1856_v21 = vmul.f32 %v2741_v57, %v4353_v10  ;;  %v1897_v49 = vmul.f32 %v1854_v41, %v4354_v55  ;;  %v1891_v10 = vsel %vm1890_vm3, %v2745_v25, %v1887_v48 }
 0x66e   : > { %v1896_v29 = vsel %vm1893_vm5, %v1895_v43, %v1891_v10 }
 0x66f   : > { %v1857_v6 = vsub.f32 1.0, %v1856_v21  ;;  %v1903_v53 = vrot.slane %v1897_v49, 4  ;;  %v1900_v33 = vmul.f32 %v1896_v29, %v4358_v1  ;;  %v1902_v62 = vsel %vm1431_vm15, %v1901_v58, %v1897_v49  ;;  %v2033_v58 = vld [vmem:[#allocation10 + $0x20] sm:$0xff] }
 0x670   : > { %v1908_v2 = vperm.slane %v1902_v62, %v3799_v18  ;;  %v2029_v62 = vld [vmem:[#allocation10] sm:$0xff] }
 0x671   : > { %v1858_v15 = vmul.f32 %v2741_v57, %v1857_v6  ;;  %v1904_v59 = vsel %vm1431_vm15, %v1899_v52, %v1903_v53  ;;  %v1913_v17 = vrot.slane %v1900_v33, 4 }
 0x672   : > { %v1912_v28 = vperm.slane %v1904_v59, %v3799_v18  ;;  %v2032_v59 = vld [vmem:[#allocation10 + $0x18] sm:$0xff] }
 0x673   : > { %v1859_v54 = vadd.f32 %v2741_v57, %v1858_v15 }
 0x674   : > { %v1939_v61 = vrot.slane %v1912_v28, 4 }
 0x675   : > { %v1863_v42 = vsel %vm4071_vm12, %v2741_v57, %v1859_v54  ;;  %v1927_v57 = vrot.slane %v1908_v2, 4 }
 0x676   : > { %v1868_v46 = vsel %vm1865_vm14, %v1867_v23, %v1863_v42 }
 0x677   : > { %v1898_v51 = vmul.f32 %v1868_v46, %v4356_v60  ;;  %v2035_v60 = vld [vmem:[#allocation10 + $0x30] sm:$0xff] }
 0x678   : > { %2053 = vmatpush.msra.mxu0 %v2035_v60 }
 0x679   : > { %v1915_v56 = vrot.slane %v1898_v51, 4  ;;  %v1914_v1 = vsel %vm1431_vm15, %v1913_v17, %v1898_v51 }
 0x67a   : > { %v1920_v3 = vperm.slane %v1914_v1, %v3799_v18  ;;  %2054 = vmatpush.msra.mxu0 %v2034_v0  ;;  %v2733_v0 = vld [vmem:[%s4380_s24] ss:$0 sm:$0xff] }
 0x67b   : > { %v1916_v55 = vsel %vm1431_vm15, %v1900_v33, %v1915_v56 }
 0x67c   : > { %v1924_v44 = vperm.slane %v1916_v55, %v3799_v18  ;;  %v1925_v19 = vrot.slane %v1920_v3, 4  ;;  %v1928_v20 = vsel %vm1431_vm15, %v1920_v3, %v1927_v57  ;;  %2055 = vmatpush.msra.mxu0 %v2033_v58 }
 0x67d   : > { %v1936_v22 = vperm.slane %v1928_v20, %v3804_v27 }
 0x67e   : > { %v1937_v5 = vrot.slane %v1924_v44, 4  ;;  %v1940_v14 = vsel %vm1431_vm15, %v1924_v44, %v1939_v61  ;;  %v1926_v25 = vsel %vm1431_vm15, %v1925_v19, %v1908_v2  ;;  %2056 = vmatpush.msra.mxu0 %v2032_v59 }
 0x67f   : > { %v1948_v16 = vperm.slane %v1940_v14, %v3804_v27  ;;  %v1932_v6 = vperm.slane %v1926_v25, %v3804_v27  ;;  %v1951_v7 = vrot.slane %v1936_v22, 4  ;;  %v2102_v25 = vld [vmem:[#allocation12 + $0x28] sm:$0xff] }
 0x680   : > { %v1938_v21 = vsel %vm1431_vm15, %v1937_v5, %v1912_v28  ;;  %v2031_v28 = vld [vmem:[#allocation10 + $0x10] sm:$0xff] }
 0x681   : > { %v1944_v23 = vperm.slane %v1938_v21, %v3804_v27  ;;  %v1955_v24 = vrot.slane %v1948_v16, 4  ;;  %v1949_v13 = vrot.slane %v1932_v6, 4  ;;  %v1952_v15 = vsel %vm1431_vm15, 0.0, %v1951_v7  ;;  %2057 = vmatpush.msra.mxu0 %v2031_v28  ;;  %v2737_v28 = vld [vmem:[%s4386_s5] ss:$0 sm:$0xff] }
 0x682   : > { %v1957_v32 = vsel %vm1431_vm15, %v1951_v7, %v1932_v6  ;;  %v1962_v35 = vrot.slane %v1952_v15, 4  ;;  %v2100_v6 = vld [vmem:[#allocation12 + $0x18] sm:$0xff]  ;;  %v2099_v7 = vld [vmem:[#allocation12 + $0x10] sm:$0xff] }
 0x683   : > { %v1953_v45 = vrot.slane %v1944_v23, 4  ;;  %v1956_v9 = vsel %vm1431_vm15, 0.0, %v1955_v24  ;;  %v1968_v11 = vsel %vm1431_vm15, %v1955_v24, %v1944_v23  ;;  %v1961_v34 = vperm.slane %v1957_v32, %v3799_v18  ;;  %v2104_v23 = vld [vmem:[#allocation12 + $0x38] sm:$0xff]  ;;  %v2103_v24 = vld [vmem:[#allocation12 + $0x30] sm:$0xff] }
 0x684   : > { %v1973_v12 = vrot.slane %v1956_v9, 4  ;;  %v1972_v30 = vperm.slane %v1968_v11, %v3799_v18  ;;  %v1950_v54 = vsel %vm1431_vm15, 0.0, %v1949_v13  ;;  %2120 = vmatpush.msra.mxu1 %v2104_v23  ;;  %v2097_v9 = vld [vmem:[#allocation12] sm:$0xff]  ;;  %v2148_v11 = vld [vmem:[%s4381_s9 + $0x78] sm:$0xff] }
 0x685   : > { %v1954_v31 = vsel %vm1431_vm15, 0.0, %v1953_v45  ;;  %v1963_v37 = vsel %vm1431_vm15, %v1962_v35, %v1950_v54  ;;  %v1981_v8 = vrot.slane %v1961_v34, 4  ;;  %v2098_v45 = vld [vmem:[#allocation12 + $0x8] sm:$0xff]  ;;  %2153 = vmatpush.msra.mxu2 %v2148_v11  ;;  %v2145_v32 = vld [vmem:[%s4381_s9 + $0x60] sm:$0xff]  ;;  %v2144_v35 = vld [vmem:[%s4381_s9 + $0x58] sm:$0xff] }
 0x686   : > { %v1974_v36 = vsel %vm1431_vm15, %v1973_v12, %v1954_v31  ;;  %v1993_v38 = vrot.slane %v1972_v30, 4  ;;  %v1967_v40 = vperm.slane %v1963_v37, %v3799_v18  ;;  %2121 = vmatpush.msra.mxu1 %v2103_v24  ;;  %v2147_v12 = vld [vmem:[%s4381_s9 + $0x70] sm:$0xff]  ;;  %v2146_v13 = vld [vmem:[%s4381_s9 + $0x68] sm:$0xff] }
 0x687   : > { %v1978_v4 = vperm.slane %v1974_v36, %v3799_v18  ;;  %2154 = vmatpush.msra.mxu2 %v2147_v12  ;;  %v2141_v36 = vld [vmem:[%s4381_s9 + $0x40] sm:$0xff] }
 0x688   : > { %v1979_v42 = vrot.slane %v1967_v40, 4  ;;  %v1982_v46 = vsel %vm1431_vm15, %v1967_v40, %v1981_v8  ;;  %2122 = vmatpush.msra.mxu1 %v2102_v25  ;;  %v2138_v40 = vld [vmem:[%s4381_s9 + $0x28] sm:$0xff] }
 0x689   : > { %v1991_v41 = vrot.slane %v1978_v4, 4  ;;  %v1994_v47 = vsel %vm1431_vm15, %v1978_v4, %v1993_v38  ;;  %v1990_v48 = vperm.slane %v1982_v46, %v3804_v27  ;;  %2155 = vmatpush.msra.mxu2 %v2146_v13  ;;  %v2140_v4 = vld [vmem:[%s4381_s9 + $0x38] sm:$0xff]  ;;  %v2139_v38 = vld [vmem:[%s4381_s9 + $0x30] sm:$0xff] }
 0x68a   : > { %v1980_v49 = vsel %vm1431_vm15, %v1979_v42, %v1961_v34  ;;  %v2002_v10 = vperm.slane %v1994_v47, %v3804_v27  ;;  %v2137_v42 = vld [vmem:[%s4381_s9 + $0x20] sm:$0xff]  ;;  %v2136_v46 = vld [vmem:[%s4381_s9 + $0x18] sm:$0xff] }
 0x68b   : > { %v1992_v43 = vsel %vm1431_vm15, %v1991_v41, %v1972_v30  ;;  %v1986_v50 = vperm.slane %v1980_v49, %v3804_v27  ;;  %v2009_v52 = vrot.slane %v1990_v48, 4  ;;  %2156 = vmatpush.msra.mxu2 %v2145_v32  ;;  %v2143_v30 = vld [vmem:[%s4381_s9 + $0x50] sm:$0xff] }
 0x68c   : > { %v1998_v51 = vperm.slane %v1992_v43, %v3804_v27  ;;  %v2007_v56 = vrot.slane %v2002_v10, 4  ;;  %v2030_v27 = vld [vmem:[#allocation10 + $0x8] sm:$0xff] }
 0x68d   : > { %v2005_v18 = vrot.slane %v1986_v50, 4  ;;  %v2010_v53 = vsel %vm1431_vm15, %v2002_v10, %v2009_v52  ;;  %2058 = vmatpush.msra.mxu0 %v2030_v27  ;;  %2157 = vmatpush.msra.mxu2 %v2144_v35 }
 0x68e   : > { %2020 = vrot.lane.b32.xlu1 %v2010_v53, %s3157_s14  ;;  %v2008_v33 = vsel %vm1431_vm15, %v2007_v56, %v1990_v48  ;;  %v2003_v55 = vrot.slane %v1998_v51, 4  ;;  %v2734_v48 = vld [vmem:[%s4382_s21] ss:$0 sm:$0xff]  ;;  %v2134_v53 = vld [vmem:[%s4381_s9 + $0x8] sm:$0xff] }
 0x68f   : > { %v2006_v29 = vsel %vm1431_vm15, %v1998_v51, %v2005_v18  ;;  %2059 = vmatpush.msra.mxu0 %v2029_v62  ;;  %2158 = vmatpush.msra.mxu2 %v2143_v30  ;;  %v2135_v18 = vld [vmem:[%s4381_s9 + $0x10] sm:$0xff]  ;;  %v2736_v56 = vld [vmem:[%s4385_s11] ss:$0 sm:$0xff]  ;;  %s2918_s11 = scalar_lea.hbm %s4388_s16, 32 }
 0x690   : > { %2012 = vrot.lane.b32.xlu0 %v2006_v29, %s3158_s4  ;;  %v2004_v63 = vsel %vm1431_vm15, %v2003_v55, %v1986_v50  ;;  %s4383_s4 = sld [smem:[#allocation40_spill]]  ;;  %v2133_v29 = vld [vmem:[%s4381_s9] sm:$0xff] }
 0x696   : > { %v2735_v51 = vld [vmem:[%s4383_s4] ss:$0 sm:$0xff] }
 0x698   : > { %2016 = vrot.lane.b32.xlu0 %v2008_v33, %s3159_s7  ;;  %s4384_s7 = sld [smem:[#allocation21_spill]] }
 0x69e   : > { %s2417_s23 = sshll.u32 %s4384_s7, 1 }
 0x69f   : > { %s2186_s12 = sadd.s32 %s3068_s1, %s2417_s23  ;;  %s2176_s1 = scalar_lea.sflag [#allocation6], %s695_s13 }
 0x6a0   : > { %s2418_s18 = sshll.u32 %s2186_s12, 3 }
 0x6a1   : > { %s2188_s24 = scalar_lea.hbm %s4388_s16, %s2418_s18 }
 0x6a2   : > { %s2192_s27 = sshll.u32 %s2188_s24, 4  ;;  %s2193_s27 = int_to_ptr.hbm [resolvable:$true] %s2192_s27 }
 0x6a3   : > { %s2912_s7 = sshra.s32 %s2193_s27, 4  ;;  %s2913_s7 = int_to_ptr.hbm [resolvable:$true] %s2912_s7 }
 0x6a4   : > { %s2914_s25 = scalar_lea.hbm %s2913_s7, 8  ;;  %p2919_p4 = scmp.lt.s32.totalorder %s2913_s7, %s4388_s16 }
 0x6a5   : > { %p2915_p11 = scmp.ne.s32.totalorder %s2913_s7, %s2914_s25  ;;  %p2920_p5 = scmp.lt.s32.totalorder %s2918_s11, %s2914_s25 }
 0x6a7   : > { %p2916_p0 = pnand %p2915_p11, %p3326_p7  ;;  %p2921_p6 = por %p2920_p5, %p2919_p4 }
 0x6a9   : > { %p2917_p2 = pneg %p2916_p0 }
 0x6ab   : > { %p2922_p8 = pnand %p2921_p6, %p2917_p2 }
 0x700   : > { %v2021_v60 = vpop.permute.xlu1 %2020 }
 0x702   : > { %v2013_v17 = vpop.permute.xlu0 %2012 }
 0x703   : > { %v2024_v2 = vsel %vm1575_vm0, %v2004_v63, %v2013_v17 }
 0x70a   : > { %v2017_v44 = vpop.permute.xlu0 %2016 }
 0x70b   : > { %v2026_v61 = vsel %vm2025_vm4, %v2024_v2, %v2017_v44 }
 0x70c   : > { %v2028_v1 = vsel %vm2027_vm6, %v2026_v61, %v2021_v60 }
 0x70d   : > { %2414 = vmatmul.msk.f32.vlgmr.msra.gmra.mxu0 %vm1347_vm10, %v2028_v1 }
 0x78a   : > { %v2061_v3 = vpop.f32.mrf.mxu0 }
 0x78b   : > { %v2062_v57 = vadd.f32 %v2733_v0, %v2061_v3 }
 0x78d   : > { %v4141_v5 = vadd.f32 %v2062_v57, %v3757_v26  ;;  %v2101_v26 = vld [vmem:[#allocation12 + $0x20] sm:$0xff] }
 0x78e   : > { %2123 = vmatpush.msra.mxu1 %v2101_v26 }
 0x78f   : > { %v2067_v14 = vsel %vm1347_vm10, %v4141_v5, 0.0 }
 0x790   : > { %2068 = vadd.xlane.f32.xlu1 %v2067_v14  ;;  %2124 = vmatpush.msra.mxu1 %v2100_v6 }
 0x792   : > { %2125 = vmatpush.msra.mxu1 %v2099_v7 }
 0x794   : > { %2126 = vmatpush.msra.mxu1 %v2098_v45 }
 0x796   : > { %2127 = vmatpush.msra.mxu1 %v2097_v9 }
 0x803   : > { %v2069_v16 = vpop.xlane.xlu1 %2068 }
 0x804   : > { %v2070_v19 = vmul.f32 %v2069_v16, %v3761_v39 }
 0x806   : > { %v2071_v20 = vsub.f32 %v4141_v5, %v2070_v19 }
 0x808   : > { %v2072_v21 = vmul.f32 %v2071_v20, %v2071_v20 }
 0x80a   : > { %v2073_v22 = vsel %vm1347_vm10, %v2072_v21, 0.0 }
 0x80b   : > { %2074 = vadd.xlane.f32.xlu2 %v2073_v22 }
 0x87e   : > { %v2075_v15 = vpop.xlane.xlu2 %2074 }
 0x87f   : > { %v2076_v31 = vmul.f32 %v2075_v15, %v3761_v39  ;;  %v2142_v39 = vld [vmem:[%s4381_s9 + $0x48] sm:$0xff] }
 0x880   : > { %2159 = vmatpush.msra.mxu2 %v2142_v39 }
 0x881   : > { %v2077_v34 = vadd.f32 1e-06, %v2076_v31 }
 0x882   : > { %2160 = vmatpush.msra.mxu2 %v2141_v36 }
 0x883   : > { %2746 = vrsqrt.f32 %v2077_v34  ;;  %vm2084_vm0 = vweird.f32 %v2077_v34 }
 0x884   : > { %2161 = vmatpush.msra.mxu2 %v2140_v4 }
 0x886   : > { %2162 = vmatpush.msra.mxu2 %v2139_v38 }
 0x888   : > { %2163 = vmatpush.msra.mxu2 %v2138_v40 }
 0x889   : > { %v2747_v54 = vpop.eup %2746 }
 0x88a   : > { %v2079_v37 = vmul.f32 %v2747_v54, %v2077_v34  ;;  %vm2085_vm15 = vweird.f32 %v2747_v54  ;;  %2164 = vmatpush.msra.mxu2 %v2137_v42 }
 0x88b   : > { %vm2086_vm7 = vmor %vm2084_vm0, %vm2085_vm15 }
 0x88c   : > { %v2080_v8 = vmul.f32 %v2747_v54, %v2079_v37  ;;  %2165 = vmatpush.msra.mxu2 %v2136_v46 }
 0x88e   : > { %v2081_v41 = vmul.f32 0.5, %v2080_v8  ;;  %2166 = vmatpush.msra.mxu2 %v2135_v18 }
 0x890   : > { %v2082_v43 = vsub.f32 1.5, %v2081_v41  ;;  %2167 = vmatpush.msra.mxu2 %v2134_v53 }
 0x892   : > { %v2083_v47 = vmul.f32 %v2747_v54, %v2082_v43  ;;  %2168 = vmatpush.msra.mxu2 %v2133_v29 }
 0x894   : > { %v2087_v49 = vsel %vm2086_vm7, %v2747_v54, %v2083_v47 }
 0x895   : > { %v2088_v50 = vmul.f32 %v2087_v49, %v2071_v20 }
 0x897   : > { %v2092_v10 = vmul.f32 %v2734_v48, %v2088_v50 }
 0x899   : > { %v2096_v52 = vadd.f32 %v2735_v51, %v2092_v10 }
 0x89b   : > { %2415 = vmatmul.msk.f32.vlgmr.msra.gmra.mxu1 %vm1347_vm10, %v2096_v52 }
 0x918   : > { %v2129_v33 = vpop.f32.mrf.mxu1 }
 0x919   : > { %v2130_v58 = vadd.f32 %v2736_v56, %v2129_v33 }
 0x91b   : > { %v2132_v59 = vmax.f32 %v2130_v58, 0.0 }
 0x91d   : > { %2169 = vmatmul.f32.vlgmr.msra.gmra.mxu2 %v2132_v59 }
 0x9a0   : > { %v2170_v27 = vpop.f32.mrf.mxu2 }
 0x9a1   : > { %v2171_v62 = vadd.f32 %v2737_v28, %v2170_v27 }
 0x9a3   : > { %v2173_v17 = vadd.f32 %v2171_v62, %v4141_v5 }
 0x9a5   : > { %2174 = vst.msk [vmem:[%s697_s26] sm:$0xff] %vm1347_vm10, %v2173_v17 }
 0x9a6   : > { %2925 = shalt.err (!%p2922_p8)
}
 0x9a7   : > { %2454 = dma.vmem_to_hbm [thread:$0]  (%p3326_p7), %s2191_s30, 128, %s2193_s27, %s2176_s1  }
 0x9a8 PF: > { %s4389_s13 = sld [smem:[#allocation19_spill]]  ;;  %p2484_p10 = scmp.ge.s32.totalorder %s3084_s2, 2 }
 0x9aa   : > { %p2474_p12 = pnand %p2484_p10, %p3331_p9 }
 0x9ac   : > { %p2475_p13 = pneg %p2474_p12 }
 0x9ae   : > { %s2204_s26 = sand.u32 1, %s4389_s13  }
 0x9af   : > { %s2205_s18 = scalar_lea.sflag [#allocation6], %s2204_s26 }
 0x9b0   : > { %3039 = dma.done.wait (%p2475_p13), %s2205_s18, 128  }
 0x9b1   : > { %3041 = vsyncadd (%p2475_p13), %s2205_s18, 4294967168  ;;  %s38_s2 = sadd.s32 1, %s3084_s2   ;;  %s4391_s15 = sld [smem:[#allocation28_spill]] }
 0x9b2   : > { %p35_p3 = scmp.ge.s32.totalorder %s38_s2, 6   ;;  %s4392_s21 = sld [smem:[#allocation20_spill]] }
 0x9b3   : > { %s4393_s19 = sld [smem:[#allocation27_spill]]  ;;  %s4397_s27 = smov %s3048_s28 }
 0x9b4   : > { %s4394_s1 = sld [smem:[#allocation22_spill]]  ;;  %s4398_s28 = smov %s3052_s29 }
 0x9b5   : > { %s4395_s5 = sld [smem:[#allocation25_spill]]  ;;  %s4400_s30 = smov %s3060_s0 }
 0x9b6   : > { %s4396_s14 = sld [smem:[#allocation26_spill]]  ;;  %s4402_s20 = smov %s3080_s22 }
 0x9b7   : > { %s4399_s29 = smov %s4391_s15 }
 0x9b8   : > { %s4401_s0 = smov %s4392_s21  ;;  %37 = sbr.rel (!%p35_p3) target bundleno = 30 (0x1e), region = 188 }
 0x9bb   : > { %s4403_s21 = smov %s4395_s5 }
 0x9bc   : > { %s4404_s22 = smov %s4396_s14 }
 0x9bd   :  { %2211 = vsyncpa [#allocation5], 1 }
 0x9be   :  { %2213 = vsyncpa [#allocation5 + $0x1], 1 }
 0x9bf   :  { %2214 = vsyncpa [#allocation8], 1 }
 0x9c0   :  { %2216 = vsyncpa [#allocation8 + $0x1], 1 }
 0x9c1   :  { %2217 = vsyncpa [#allocation11], 1 }
 0x9c2   :  { %2218 = vsyncpa [#allocation6], 1 }
 0x9c3   :  { %2220 = vsyncpa [#allocation6 + $0x1], 1 }

</bundles_post_ra>
